<compile_context>
chip_gen: v6e
topology: v6e:2x2x1
jax: 0.10.0
libtpu: 0.0.40
codegen_flags: <defaults>
</compile_context>

<pallas_src>
import jax
import jax.numpy as jnp
from jax.experimental import pallas as pl
from jax.experimental.pallas import tpu as pltpu


# NB201-style genotype: entry i describes node i+1 as ((op_name, input_node), ...)
GENOTYPE = (
    (("nor_conv_3x3", 0),),
    (("nor_conv_1x1", 0), ("avg_pool_3x3", 1)),
    (("skip_connect", 0), ("nor_conv_3x3", 1), ("skip_connect", 2)),
)

_CONV_OPS = {"nor_conv_3x3": 3, "nor_conv_1x1": 1}
_BN_EPS = 1e-5
_LANE = 128


def _round_up(x, m):
    return (x + m - 1) // m * m


# ----------------------------------------------------------------------------
# Pallas kernel (one batch sample per grid step, NHWC, channels padded to 128)
# ----------------------------------------------------------------------------
def _make_cell_kernel(genotype, H, W, Cp):
    def kernel(x_ref, rc_ref, w3_ref, w1_ref, b_ref, o_ref, pad_ref, col_ref):
        # -- zero only the 1-pixel halo of the padded scratch once per step;
        #    the interior is always fully overwritten before each use.
        zrow = jnp.zeros((1, W + 2, Cp), jnp.float32)
        pad_ref[0:1] = zrow
        pad_ref[H + 1:H + 2] = zrow
        zcol = jnp.zeros((H + 2, 1, Cp), jnp.float32)
        pad_ref[:, 0:1, :] = zcol
        pad_ref[:, W + 1:W + 2, :] = zcol

        def write_interior(x):                       # x: (H, W, Cp) f32
            pad_ref[1:H + 1, 1:W + 1, :] = x

        def relu_conv3x3_bn(x, w_idx, b_idx):
            # ReLU -> im2col -> single bf16 MXU matmul (K = 9*Cp), f32 accum.
            # BN scale already folded into the weight columns; bias add only.
            write_interior(jnp.maximum(x, 0.0))
            for kh in range(3):
                for kw in range(3):
                    t = kh * 3 + kw
                    col_ref[:, t * Cp:(t + 1) * Cp] = (
                        pad_ref[kh:kh + H, kw:kw + W, :]
                        .reshape(H * W, Cp).astype(jnp.bfloat16))
            y = jnp.dot(col_ref[...], w3_ref[w_idx],
                        preferred_element_type=jnp.float32)
            return (y + b_ref[b_idx]).reshape(H, W, Cp)

        def relu_conv1x1_bn(x, w_idx, b_idx):
            xr = jnp.maximum(x, 0.0).reshape(H * W, Cp).astype(jnp.bfloat16)
            y = jnp.dot(xr, w1_ref[w_idx], preferred_element_type=jnp.float32)
            return (y + b_ref[b_idx]).reshape(H, W, Cp)

        def avg_pool_3x3(x):
            # AvgPool2d(3, stride=1, padding=1, count_include_pad=False)
            write_interior(x)
            acc = jnp.zeros((H, W, Cp), jnp.float32)
            for kh in range(3):
                for kw in range(3):
                    acc = acc + pad_ref[kh:kh + H, kw:kw + W, :]
            return acc * rc_ref[0]                   # (H, W, 1) reciprocal counts

        nodes = [x_ref[0]]                           # (H, W, Cp) f32
        i3 = i1 = ib = 0
        for node_info in genotype:
            feat = None
            for op_name, op_in in node_info:
                xin = nodes[op_in]
                if op_name == "nor_conv_3x3":
                    y = relu_conv3x3_bn(xin, i3, ib); i3 += 1; ib += 1
                elif op_name == "nor_conv_1x1":
                    y = relu_conv1x1_bn(xin, i1, ib); i1 += 1; ib += 1
                elif op_name == "avg_pool_3x3":
                    y = avg_pool_3x3(xin)
                elif op_name == "skip_connect":
                    y = xin
                elif op_name == "none":
                    y = jnp.zeros_like(xin)
                else:
                    raise ValueError(f"unsupported op {op_name}")
                feat = y if feat is None else feat + y
            nodes.append(feat)

        o_ref[0] = nodes[-1].astype(o_ref.dtype)

    return kernel


# ----------------------------------------------------------------------------
# Parameter setup: deterministic synthetic init, BN folded, packed & padded
# ----------------------------------------------------------------------------
def init_infer_cell_params(genotype, C, key):
    """Build BN-folded, channel-padded, bf16 weights packed into 3 stacks.

    Returns dict with:
      'w3'  : (n_3x3, 9*Cp, Cp) bf16    'w1'  : (n_1x1, Cp, Cp) bf16
      'bias': (n_conv, 1, Cp)  f32      'raw' : unpadded (ksz, w_bf16, bias) list
    """
    Cp = _round_up(C, _LANE)
    w3, w1, bias, raw = [], [], [], []
    for node_info in genotype:
        for op_name, _ in node_info:
            if op_name not in _CONV_OPS:
                continue
            ksz = _CONV_OPS[op_name]
            key, kw_, kg, kb, km, kv = jax.random.split(key, 6)
            fan_in = ksz * ksz * C
            w = jax.random.normal(kw_, (ksz, ksz, C, C), jnp.float32) / jnp.sqrt(fan_in)
            gamma = 1.0 + 0.1 * jax.random.normal(kg, (C,), jnp.float32)
            beta = 0.1 * jax.random.normal(kb, (C,), jnp.float32)
            rmean = 0.1 * jax.random.normal(km, (C,), jnp.float32)
            rvar = 1.0 + 0.1 * jnp.abs(jax.random.normal(kv, (C,), jnp.float32))
            scale = gamma * jax.lax.rsqrt(rvar + _BN_EPS)       # eval-mode BN
            b = beta - rmean * scale
            wf = (w * scale[None, None, None, :]).astype(jnp.bfloat16)  # fold scale
            wp = jnp.zeros((ksz, ksz, Cp, Cp), jnp.bfloat16).at[:, :, :C, :C].set(wf)
            bp = jnp.zeros((1, Cp), jnp.float32).at[0, :C].set(b)
            if ksz == 3:
                w3.append(wp.reshape(9 * Cp, Cp))
            else:
                w1.append(wp.reshape(Cp, Cp))
            bias.append(bp)
            raw.append((ksz, wf, b))
    if not w3:
        w3 = [jnp.zeros((9 * Cp, Cp), jnp.bfloat16)]
    if not w1:
        w1 = [jnp.zeros((Cp, Cp), jnp.bfloat16)]
    if not bias:
        bias = [jnp.zeros((1, Cp), jnp.float32)]
    return {"w3": jnp.stack(w3), "w1": jnp.stack(w1),
            "bias": jnp.stack(bias), "raw": raw, "Cp": Cp}


def _pool_recip_counts(H, W):
    r = jnp.arange(H, dtype=jnp.float32)
    c = jnp.arange(W, dtype=jnp.float32)
    ch = 3.0 - (r == 0).astype(jnp.float32) - (r == H - 1).astype(jnp.float32)
    cw = 3.0 - (c == 0).astype(jnp.float32) - (c == W - 1).astype(jnp.float32)
    return 1.0 / (ch[:, None] * cw[None, :])                    # (H, W)


def infer_cell_forward(x_nchw, params, genotype=GENOTYPE):
    N, C, H, W = x_nchw.shape
    Cp = params["Cp"]
    x = jnp.transpose(x_nchw, (0, 2, 3, 1)).astype(jnp.float32)           # NHWC
    if Cp != C:
        x = jnp.zeros((N, H, W, Cp), jnp.float32).at[..., :C].set(x)      # lane-pad C
    rc = _pool_recip_counts(H, W).reshape(1, H, W, 1)

    n3 = params["w3"].shape[0]
    n1 = params["w1"].shape[0]
    nb = params["bias"].shape[0]
    kernel = _make_cell_kernel(genotype, H, W, Cp)

    out = pl.pallas_call(
        kernel,
        out_shape=jax.ShapeDtypeStruct((N, H, W, Cp), jnp.float32),
        grid_spec=pltpu.PrefetchScalarGridSpec(
            num_scalar_prefetch=0,
            grid=(N,),                                   # one sample per grid step
            in_specs=[
                pl.BlockSpec((1, H, W, Cp), lambda n: (n, 0, 0, 0)),   # x
                pl.BlockSpec((1, H, W, 1), lambda n: (0, 0, 0, 0)),    # recip counts
                pl.BlockSpec((n3, 9 * Cp, Cp), lambda n: (0, 0, 0)),   # 3x3 weights
                pl.BlockSpec((n1, Cp, Cp), lambda n: (0, 0, 0)),       # 1x1 weights
                pl.BlockSpec((nb, 1, Cp), lambda n: (0, 0, 0)),        # biases
            ],
            out_specs=pl.BlockSpec((1, H, W, Cp), lambda n: (n, 0, 0, 0)),
            scratch_shapes=[
                pltpu.VMEM((H + 2, W + 2, Cp), jnp.float32),   # zero-padded feature
                pltpu.VMEM((H * W, 9 * Cp), jnp.bfloat16),     # im2col slab
            ],
        ),
        compiler_params=pltpu.CompilerParams(
            dimension_semantics=("parallel",),
            vmem_limit_bytes=48 * 1024 * 1024,      # safe on v5e/v6e (128 MiB) & v7x (64 MiB)
        ),
    )(x, rc, params["w3"], params["w1"], params["bias"])

    return jnp.transpose(out[..., :C], (0, 3, 1, 2))                      # back to NCHW


# ----------------------------------------------------------------------------
# Pure-JAX reference (same bf16-folded weights; correctness check only)
# ----------------------------------------------------------------------------
def infer_cell_reference(x_nchw, params, genotype=GENOTYPE):
    N, C, H, W = x_nchw.shape
    x = jnp.transpose(x_nchw, (0, 2, 3, 1)).astype(jnp.float32)
    rc = _pool_recip_counts(H, W)[None, :, :, None]

    def relu_conv_bn(xin, ksz, w_bf16, bias):
        xr = jnp.maximum(xin, 0.0).astype(jnp.bfloat16)
        p = ksz // 2
        y = jax.lax.conv_general_dilated(
            xr, w_bf16, window_strides=(1, 1), padding=[(p, p), (p, p)],
            dimension_numbers=("NHWC", "HWIO", "NHWC"),
            preferred_element_type=jnp.float32)
        return y + bias.reshape(1, 1, 1, C)

    def avg_pool(xin):
        xp = jnp.pad(xin, ((0, 0), (1, 1), (1, 1), (0, 0)))
        acc = jnp.zeros_like(xin)
        for kh in range(3):
            for kw in range(3):
                acc = acc + xp[:, kh:kh + H, kw:kw + W, :]
        return acc * rc

    nodes, p = [x], 0
    for node_info in genotype:
        feat = None
        for op_name, op_in in node_info:
            xin = nodes[op_in]
            if op_name in _CONV_OPS:
                ksz, wf, b = params["raw"][p]
                y = relu_conv_bn(xin, ksz, wf, b)
                p += 1
            elif op_name == "avg_pool_3x3":
                y = avg_pool(xin)
            elif op_name == "skip_connect":
                y = xin
            else:
                y = jnp.zeros_like(xin)
            feat = y if feat is None else feat + y
        nodes.append(feat)
    return jnp.transpose(nodes[-1], (0, 3, 1, 2))


if __name__ == "__main__":
    key = jax.random.PRNGKey(0)
    kx, kp = jax.random.split(key)
    N, C, H, W = 2, 16, 8, 8                      # small NCHW input
    x = jax.random.normal(kx, (N, C, H, W), jnp.float32)
    params = init_infer_cell_params(GENOTYPE, C, kp)

    out = jax.block_until_ready(infer_cell_forward(x, params))
    ref = jax.block_until_ready(infer_cell_reference(x, params))

    assert out.shape == (N, C, H, W), out.shape
    max_diff = float(jnp.max(jnp.abs(out - ref)))
    assert bool(jnp.allclose(out, ref, rtol=2e-2, atol=2e-2)), \
        f"max abs diff {max_diff}"
    print("KERNEL_OK")
</pallas_src>

<mosaic_0001>
module attributes {stable_mosaic.version = 11 : i64} {
  func.func @kernel(%arg0: i32, %arg1: memref<1x8x8x128xf32, #tpu.memory_space<vmem>>, %arg2: memref<1x8x8x1xf32, #tpu.memory_space<vmem>>, %arg3: memref<2x1152x128xbf16, #tpu.memory_space<vmem>>, %arg4: memref<1x128x128xbf16, #tpu.memory_space<vmem>>, %arg5: memref<3x1x128xf32, #tpu.memory_space<vmem>>, %arg6: memref<1x8x8x128xf32, #tpu.memory_space<vmem>>, %arg7: memref<10x10x128xf32, #tpu.memory_space<vmem>>, %arg8: memref<64x1152xbf16, #tpu.memory_space<vmem>>) attributes {dimension_semantics = [#tpu.dimension_semantics<parallel>], iteration_bounds = array<i64: 2>, scalar_prefetch = 0 : i64, scratch_operands = 2 : i64, tpu.core_type = #tpu.core_type<tc>, window_params = [{transform_indices = @transform_0, window_bounds = array<i64: 1, 8, 8, 128>}, {pipeline_mode = #tpu.pipeline_mode<synchronous>, transform_indices = @transform_1, window_bounds = array<i64: 1, 8, 8, 1>}, {pipeline_mode = #tpu.pipeline_mode<synchronous>, transform_indices = @transform_2, window_bounds = array<i64: 2, 1152, 128>}, {pipeline_mode = #tpu.pipeline_mode<synchronous>, transform_indices = @transform_3, window_bounds = array<i64: 1, 128, 128>}, {pipeline_mode = #tpu.pipeline_mode<synchronous>, transform_indices = @transform_4, window_bounds = array<i64: 3, 1, 128>}, {transform_indices = @transform_5, window_bounds = array<i64: 1, 8, 8, 128>}]} {
    %cst = arith.constant 0.000000e+00 : f32
    %0 = vector.broadcast %cst : f32 to vector<1x10x128xf32>
    %c0 = arith.constant 0 : index
    %c0_0 = arith.constant 0 : index
    %c0_1 = arith.constant 0 : index
    %1 = vector.load %arg7[%c0, %c0_0, %c0_1] : memref<10x10x128xf32, #tpu.memory_space<vmem>>, vector<1x10x128xf32>
    tpu.vector_store %arg7[%c0, %c0_0, %c0_1], %0 {strides = array<i32>} : memref<10x10x128xf32, #tpu.memory_space<vmem>>, vector<1x10x128xf32>,
    %c9 = arith.constant 9 : index
    %c0_2 = arith.constant 0 : index
    %c0_3 = arith.constant 0 : index
    %2 = vector.load %arg7[%c9, %c0_2, %c0_3] : memref<10x10x128xf32, #tpu.memory_space<vmem>>, vector<1x10x128xf32>
    tpu.vector_store %arg7[%c9, %c0_2, %c0_3], %0 {strides = array<i32>} : memref<10x10x128xf32, #tpu.memory_space<vmem>>, vector<1x10x128xf32>,
    %cst_4 = arith.constant 0.000000e+00 : f32
    %3 = vector.broadcast %cst_4 : f32 to vector<10x1x128xf32>
    %c0_5 = arith.constant 0 : index
    %c0_6 = arith.constant 0 : index
    %c0_7 = arith.constant 0 : index
    %4 = vector.load %arg7[%c0_5, %c0_6, %c0_7] : memref<10x10x128xf32, #tpu.memory_space<vmem>>, vector<10x1x128xf32>
    tpu.vector_store %arg7[%c0_5, %c0_6, %c0_7], %3 {strides = array<i32>} : memref<10x10x128xf32, #tpu.memory_space<vmem>>, vector<10x1x128xf32>,
    %c0_8 = arith.constant 0 : index
    %c9_9 = arith.constant 9 : index
    %c0_10 = arith.constant 0 : index
    %5 = vector.load %arg7[%c0_8, %c9_9, %c0_10] : memref<10x10x128xf32, #tpu.memory_space<vmem>>, vector<10x1x128xf32>
    tpu.vector_store %arg7[%c0_8, %c9_9, %c0_10], %3 {strides = array<i32>} : memref<10x10x128xf32, #tpu.memory_space<vmem>>, vector<10x1x128xf32>,
    %c0_11 = arith.constant 0 : index
    %c0_12 = arith.constant 0 : index
    %c0_13 = arith.constant 0 : index
    %c0_14 = arith.constant 0 : index
    %6 = vector.load %arg1[%c0_11, %c0_12, %c0_13, %c0_14] : memref<1x8x8x128xf32, #tpu.memory_space<vmem>>, vector<1x8x8x128xf32>
    %7 = vector.shape_cast %6 : vector<1x8x8x128xf32> to vector<8x8x128xf32>
    %cst_15 = arith.constant 0.000000e+00 : f32
    %8 = vector.broadcast %cst_15 : f32 to vector<8x8x128xf32>
    %9 = arith.maximumf %7, %8 : vector<8x8x128xf32>
    %c1 = arith.constant 1 : index
    %c1_16 = arith.constant 1 : index
    %c0_17 = arith.constant 0 : index
    %10 = vector.load %arg7[%c1, %c1_16, %c0_17] : memref<10x10x128xf32, #tpu.memory_space<vmem>>, vector<8x8x128xf32>
    tpu.vector_store %arg7[%c1, %c1_16, %c0_17], %9 {strides = array<i32>} : memref<10x10x128xf32, #tpu.memory_space<vmem>>, vector<8x8x128xf32>,
    %c0_18 = arith.constant 0 : index
    %c0_19 = arith.constant 0 : index
    %c0_20 = arith.constant 0 : index
    %11 = vector.load %arg7[%c0_18, %c0_19, %c0_20] : memref<10x10x128xf32, #tpu.memory_space<vmem>>, vector<8x8x128xf32>
    %12 = vector.shape_cast %11 : vector<8x8x128xf32> to vector<64x128xf32>
    %13 = arith.truncf %12 : vector<64x128xf32> to vector<64x128xbf16>
    %c0_21 = arith.constant 0 : index
    %c0_22 = arith.constant 0 : index
    %14 = vector.load %arg8[%c0_21, %c0_22] : memref<64x1152xbf16, #tpu.memory_space<vmem>>, vector<64x128xbf16>
    tpu.vector_store %arg8[%c0_21, %c0_22], %13 {strides = array<i32>} : memref<64x1152xbf16, #tpu.memory_space<vmem>>, vector<64x128xbf16>,
    %c0_23 = arith.constant 0 : index
    %c1_24 = arith.constant 1 : index
    %c0_25 = arith.constant 0 : index
    %15 = vector.load %arg7[%c0_23, %c1_24, %c0_25] : memref<10x10x128xf32, #tpu.memory_space<vmem>>, vector<8x8x128xf32>
    %16 = vector.shape_cast %15 : vector<8x8x128xf32> to vector<64x128xf32>
    %17 = arith.truncf %16 : vector<64x128xf32> to vector<64x128xbf16>
    %c0_26 = arith.constant 0 : index
    %c128 = arith.constant 128 : index
    %18 = vector.load %arg8[%c0_26, %c128] : memref<64x1152xbf16, #tpu.memory_space<vmem>>, vector<64x128xbf16>
    tpu.vector_store %arg8[%c0_26, %c128], %17 {strides = array<i32>} : memref<64x1152xbf16, #tpu.memory_space<vmem>>, vector<64x128xbf16>,
    %c0_27 = arith.constant 0 : index
    %c2 = arith.constant 2 : index
    %c0_28 = arith.constant 0 : index
    %19 = vector.load %arg7[%c0_27, %c2, %c0_28] : memref<10x10x128xf32, #tpu.memory_space<vmem>>, vector<8x8x128xf32>
    %20 = vector.shape_cast %19 : vector<8x8x128xf32> to vector<64x128xf32>
    %21 = arith.truncf %20 : vector<64x128xf32> to vector<64x128xbf16>
    %c0_29 = arith.constant 0 : index
    %c256 = arith.constant 256 : index
    %22 = vector.load %arg8[%c0_29, %c256] : memref<64x1152xbf16, #tpu.memory_space<vmem>>, vector<64x128xbf16>
    tpu.vector_store %arg8[%c0_29, %c256], %21 {strides = array<i32>} : memref<64x1152xbf16, #tpu.memory_space<vmem>>, vector<64x128xbf16>,
    %c1_30 = arith.constant 1 : index
    %c0_31 = arith.constant 0 : index
    %c0_32 = arith.constant 0 : index
    %23 = vector.load %arg7[%c1_30, %c0_31, %c0_32] : memref<10x10x128xf32, #tpu.memory_space<vmem>>, vector<8x8x128xf32>
    %24 = vector.shape_cast %23 : vector<8x8x128xf32> to vector<64x128xf32>
    %25 = arith.truncf %24 : vector<64x128xf32> to vector<64x128xbf16>
    %c0_33 = arith.constant 0 : index
    %c384 = arith.constant 384 : index
    %26 = vector.load %arg8[%c0_33, %c384] : memref<64x1152xbf16, #tpu.memory_space<vmem>>, vector<64x128xbf16>
    tpu.vector_store %arg8[%c0_33, %c384], %25 {strides = array<i32>} : memref<64x1152xbf16, #tpu.memory_space<vmem>>, vector<64x128xbf16>,
    %c1_34 = arith.constant 1 : index
    %c1_35 = arith.constant 1 : index
    %c0_36 = arith.constant 0 : index
    %27 = vector.load %arg7[%c1_34, %c1_35, %c0_36] : memref<10x10x128xf32, #tpu.memory_space<vmem>>, vector<8x8x128xf32>
    %28 = vector.shape_cast %27 : vector<8x8x128xf32> to vector<64x128xf32>
    %29 = arith.truncf %28 : vector<64x128xf32> to vector<64x128xbf16>
    %c0_37 = arith.constant 0 : index
    %c512 = arith.constant 512 : index
    %30 = vector.load %arg8[%c0_37, %c512] : memref<64x1152xbf16, #tpu.memory_space<vmem>>, vector<64x128xbf16>
    tpu.vector_store %arg8[%c0_37, %c512], %29 {strides = array<i32>} : memref<64x1152xbf16, #tpu.memory_space<vmem>>, vector<64x128xbf16>,
    %c1_38 = arith.constant 1 : index
    %c2_39 = arith.constant 2 : index
    %c0_40 = arith.constant 0 : index
    %31 = vector.load %arg7[%c1_38, %c2_39, %c0_40] : memref<10x10x128xf32, #tpu.memory_space<vmem>>, vector<8x8x128xf32>
    %32 = vector.shape_cast %31 : vector<8x8x128xf32> to vector<64x128xf32>
    %33 = arith.truncf %32 : vector<64x128xf32> to vector<64x128xbf16>
    %c0_41 = arith.constant 0 : index
    %c640 = arith.constant 640 : index
    %34 = vector.load %arg8[%c0_41, %c640] : memref<64x1152xbf16, #tpu.memory_space<vmem>>, vector<64x128xbf16>
    tpu.vector_store %arg8[%c0_41, %c640], %33 {strides = array<i32>} : memref<64x1152xbf16, #tpu.memory_space<vmem>>, vector<64x128xbf16>,
    %c2_42 = arith.constant 2 : index
    %c0_43 = arith.constant 0 : index
    %c0_44 = arith.constant 0 : index
    %35 = vector.load %arg7[%c2_42, %c0_43, %c0_44] : memref<10x10x128xf32, #tpu.memory_space<vmem>>, vector<8x8x128xf32>
    %36 = vector.shape_cast %35 : vector<8x8x128xf32> to vector<64x128xf32>
    %37 = arith.truncf %36 : vector<64x128xf32> to vector<64x128xbf16>
    %c0_45 = arith.constant 0 : index
    %c768 = arith.constant 768 : index
    %38 = vector.load %arg8[%c0_45, %c768] : memref<64x1152xbf16, #tpu.memory_space<vmem>>, vector<64x128xbf16>
    tpu.vector_store %arg8[%c0_45, %c768], %37 {strides = array<i32>} : memref<64x1152xbf16, #tpu.memory_space<vmem>>, vector<64x128xbf16>,
    %c2_46 = arith.constant 2 : index
    %c1_47 = arith.constant 1 : index
    %c0_48 = arith.constant 0 : index
    %39 = vector.load %arg7[%c2_46, %c1_47, %c0_48] : memref<10x10x128xf32, #tpu.memory_space<vmem>>, vector<8x8x128xf32>
    %40 = vector.shape_cast %39 : vector<8x8x128xf32> to vector<64x128xf32>
    %41 = arith.truncf %40 : vector<64x128xf32> to vector<64x128xbf16>
    %c0_49 = arith.constant 0 : index
    %c896 = arith.constant 896 : index
    %42 = vector.load %arg8[%c0_49, %c896] : memref<64x1152xbf16, #tpu.memory_space<vmem>>, vector<64x128xbf16>
    tpu.vector_store %arg8[%c0_49, %c896], %41 {strides = array<i32>} : memref<64x1152xbf16, #tpu.memory_space<vmem>>, vector<64x128xbf16>,
    %c2_50 = arith.constant 2 : index
    %c2_51 = arith.constant 2 : index
    %c0_52 = arith.constant 0 : index
    %43 = vector.load %arg7[%c2_50, %c2_51, %c0_52] : memref<10x10x128xf32, #tpu.memory_space<vmem>>, vector<8x8x128xf32>
    %44 = vector.shape_cast %43 : vector<8x8x128xf32> to vector<64x128xf32>
    %45 = arith.truncf %44 : vector<64x128xf32> to vector<64x128xbf16>
    %c0_53 = arith.constant 0 : index
    %c1024 = arith.constant 1024 : index
    %46 = vector.load %arg8[%c0_53, %c1024] : memref<64x1152xbf16, #tpu.memory_space<vmem>>, vector<64x128xbf16>
    tpu.vector_store %arg8[%c0_53, %c1024], %45 {strides = array<i32>} : memref<64x1152xbf16, #tpu.memory_space<vmem>>, vector<64x128xbf16>,
    %c0_54 = arith.constant 0 : index
    %c0_55 = arith.constant 0 : index
    %47 = vector.load %arg8[%c0_54, %c0_55] : memref<64x1152xbf16, #tpu.memory_space<vmem>>, vector<64x1152xbf16>
    %c0_56 = arith.constant 0 : index
    %c0_57 = arith.constant 0 : index
    %c0_58 = arith.constant 0 : index
    %48 = vector.load %arg3[%c0_56, %c0_57, %c0_58] : memref<2x1152x128xbf16, #tpu.memory_space<vmem>>, vector<1x1152x128xbf16>
    %49 = vector.shape_cast %48 : vector<1x1152x128xbf16> to vector<1152x128xbf16>
    %cst_59 = arith.constant dense<0.000000e+00> : vector<64x128xf32>
    %50 = tpu.matmul %47, %49, %cst_59 {dimension_numbers = #tpu.dot_dimension_numbers<[1], [0], [0], [1], [0, 0, 1, 1], [], []>} : vector<64x1152xbf16>, vector<1152x128xbf16>, vector<64x128xf32> -> vector<64x128xf32>
    %c0_60 = arith.constant 0 : index
    %c0_61 = arith.constant 0 : index
    %c0_62 = arith.constant 0 : index
    %51 = vector.load %arg5[%c0_60, %c0_61, %c0_62] : memref<3x1x128xf32, #tpu.memory_space<vmem>>, vector<1x1x128xf32>
    %52 = vector.shape_cast %51 : vector<1x1x128xf32> to vector<1x128xf32>
    %53 = vector.broadcast %52 : vector<1x128xf32> to vector<64x128xf32>
    %54 = arith.addf %50, %53 : vector<64x128xf32>
    %55 = vector.shape_cast %54 : vector<64x128xf32> to vector<8x8x128xf32>
    %cst_63 = arith.constant 0.000000e+00 : f32
    %56 = vector.broadcast %cst_63 : f32 to vector<8x8x128xf32>
    %57 = arith.maximumf %7, %56 : vector<8x8x128xf32>
    %58 = vector.shape_cast %57 : vector<8x8x128xf32> to vector<64x128xf32>
    %59 = arith.truncf %58 : vector<64x128xf32> to vector<64x128xbf16>
    %c0_64 = arith.constant 0 : index
    %c0_65 = arith.constant 0 : index
    %c0_66 = arith.constant 0 : index
    %60 = vector.load %arg4[%c0_64, %c0_65, %c0_66] : memref<1x128x128xbf16, #tpu.memory_space<vmem>>, vector<1x128x128xbf16>
    %61 = vector.shape_cast %60 : vector<1x128x128xbf16> to vector<128x128xbf16>
    %cst_67 = arith.constant dense<0.000000e+00> : vector<64x128xf32>
    %62 = tpu.matmul %59, %61, %cst_67 {dimension_numbers = #tpu.dot_dimension_numbers<[1], [0], [0], [1], [0, 0, 1, 1], [], []>} : vector<64x128xbf16>, vector<128x128xbf16>, vector<64x128xf32> -> vector<64x128xf32>
    %c1_68 = arith.constant 1 : index
    %c0_69 = arith.constant 0 : index
    %c0_70 = arith.constant 0 : index
    %63 = vector.load %arg5[%c1_68, %c0_69, %c0_70] : memref<3x1x128xf32, #tpu.memory_space<vmem>>, vector<1x1x128xf32>
    %64 = vector.shape_cast %63 : vector<1x1x128xf32> to vector<1x128xf32>
    %65 = vector.broadcast %64 : vector<1x128xf32> to vector<64x128xf32>
    %66 = arith.addf %62, %65 : vector<64x128xf32>
    %67 = vector.shape_cast %66 : vector<64x128xf32> to vector<8x8x128xf32>
    %c1_71 = arith.constant 1 : index
    %c1_72 = arith.constant 1 : index
    %c0_73 = arith.constant 0 : index
    %68 = vector.load %arg7[%c1_71, %c1_72, %c0_73] : memref<10x10x128xf32, #tpu.memory_space<vmem>>, vector<8x8x128xf32>
    tpu.vector_store %arg7[%c1_71, %c1_72, %c0_73], %55 {strides = array<i32>} : memref<10x10x128xf32, #tpu.memory_space<vmem>>, vector<8x8x128xf32>,
    %cst_74 = arith.constant 0.000000e+00 : f32
    %69 = vector.broadcast %cst_74 : f32 to vector<8x8x128xf32>
    %c0_75 = arith.constant 0 : index
    %c0_76 = arith.constant 0 : index
    %c0_77 = arith.constant 0 : index
    %70 = vector.load %arg7[%c0_75, %c0_76, %c0_77] : memref<10x10x128xf32, #tpu.memory_space<vmem>>, vector<8x8x128xf32>
    %71 = arith.addf %69, %70 : vector<8x8x128xf32>
    %c0_78 = arith.constant 0 : index
    %c1_79 = arith.constant 1 : index
    %c0_80 = arith.constant 0 : index
    %72 = vector.load %arg7[%c0_78, %c1_79, %c0_80] : memref<10x10x128xf32, #tpu.memory_space<vmem>>, vector<8x8x128xf32>
    %73 = arith.addf %71, %72 : vector<8x8x128xf32>
    %c0_81 = arith.constant 0 : index
    %c2_82 = arith.constant 2 : index
    %c0_83 = arith.constant 0 : index
    %74 = vector.load %arg7[%c0_81, %c2_82, %c0_83] : memref<10x10x128xf32, #tpu.memory_space<vmem>>, vector<8x8x128xf32>
    %75 = arith.addf %73, %74 : vector<8x8x128xf32>
    %c1_84 = arith.constant 1 : index
    %c0_85 = arith.constant 0 : index
    %c0_86 = arith.constant 0 : index
    %76 = vector.load %arg7[%c1_84, %c0_85, %c0_86] : memref<10x10x128xf32, #tpu.memory_space<vmem>>, vector<8x8x128xf32>
    %77 = arith.addf %75, %76 : vector<8x8x128xf32>
    %c1_87 = arith.constant 1 : index
    %c1_88 = arith.constant 1 : index
    %c0_89 = arith.constant 0 : index
    %78 = vector.load %arg7[%c1_87, %c1_88, %c0_89] : memref<10x10x128xf32, #tpu.memory_space<vmem>>, vector<8x8x128xf32>
    %79 = arith.addf %77, %78 : vector<8x8x128xf32>
    %c1_90 = arith.constant 1 : index
    %c2_91 = arith.constant 2 : index
    %c0_92 = arith.constant 0 : index
    %80 = vector.load %arg7[%c1_90, %c2_91, %c0_92] : memref<10x10x128xf32, #tpu.memory_space<vmem>>, vector<8x8x128xf32>
    %81 = arith.addf %79, %80 : vector<8x8x128xf32>
    %c2_93 = arith.constant 2 : index
    %c0_94 = arith.constant 0 : index
    %c0_95 = arith.constant 0 : index
    %82 = vector.load %arg7[%c2_93, %c0_94, %c0_95] : memref<10x10x128xf32, #tpu.memory_space<vmem>>, vector<8x8x128xf32>
    %83 = arith.addf %81, %82 : vector<8x8x128xf32>
    %c2_96 = arith.constant 2 : index
    %c1_97 = arith.constant 1 : index
    %c0_98 = arith.constant 0 : index
    %84 = vector.load %arg7[%c2_96, %c1_97, %c0_98] : memref<10x10x128xf32, #tpu.memory_space<vmem>>, vector<8x8x128xf32>
    %85 = arith.addf %83, %84 : vector<8x8x128xf32>
    %c2_99 = arith.constant 2 : index
    %c2_100 = arith.constant 2 : index
    %c0_101 = arith.constant 0 : index
    %86 = vector.load %arg7[%c2_99, %c2_100, %c0_101] : memref<10x10x128xf32, #tpu.memory_space<vmem>>, vector<8x8x128xf32>
    %87 = arith.addf %85, %86 : vector<8x8x128xf32>
    %c0_102 = arith.constant 0 : index
    %c0_103 = arith.constant 0 : index
    %c0_104 = arith.constant 0 : index
    %c0_105 = arith.constant 0 : index
    %88 = vector.load %arg2[%c0_102, %c0_103, %c0_104, %c0_105] : memref<1x8x8x1xf32, #tpu.memory_space<vmem>>, vector<1x8x8x1xf32>
    %89 = vector.shape_cast %88 : vector<1x8x8x1xf32> to vector<8x8x1xf32>
    %90 = vector.broadcast %89 : vector<8x8x1xf32> to vector<8x8x128xf32>
    %91 = arith.mulf %87, %90 : vector<8x8x128xf32>
    %92 = arith.addf %67, %91 : vector<8x8x128xf32>
    %cst_106 = arith.constant 0.000000e+00 : f32
    %93 = vector.broadcast %cst_106 : f32 to vector<8x8x128xf32>
    %94 = arith.maximumf %55, %93 : vector<8x8x128xf32>
    %c1_107 = arith.constant 1 : index
    %c1_108 = arith.constant 1 : index
    %c0_109 = arith.constant 0 : index
    %95 = vector.load %arg7[%c1_107, %c1_108, %c0_109] : memref<10x10x128xf32, #tpu.memory_space<vmem>>, vector<8x8x128xf32>
    tpu.vector_store %arg7[%c1_107, %c1_108, %c0_109], %94 {strides = array<i32>} : memref<10x10x128xf32, #tpu.memory_space<vmem>>, vector<8x8x128xf32>,
    %c0_110 = arith.constant 0 : index
    %c0_111 = arith.constant 0 : index
    %c0_112 = arith.constant 0 : index
    %96 = vector.load %arg7[%c0_110, %c0_111, %c0_112] : memref<10x10x128xf32, #tpu.memory_space<vmem>>, vector<8x8x128xf32>
    %97 = vector.shape_cast %96 : vector<8x8x128xf32> to vector<64x128xf32>
    %98 = arith.truncf %97 : vector<64x128xf32> to vector<64x128xbf16>
    %c0_113 = arith.constant 0 : index
    %c0_114 = arith.constant 0 : index
    %99 = vector.load %arg8[%c0_113, %c0_114] : memref<64x1152xbf16, #tpu.memory_space<vmem>>, vector<64x128xbf16>
    tpu.vector_store %arg8[%c0_113, %c0_114], %98 {strides = array<i32>} : memref<64x1152xbf16, #tpu.memory_space<vmem>>, vector<64x128xbf16>,
    %c0_115 = arith.constant 0 : index
    %c1_116 = arith.constant 1 : index
    %c0_117 = arith.constant 0 : index
    %100 = vector.load %arg7[%c0_115, %c1_116, %c0_117] : memref<10x10x128xf32, #tpu.memory_space<vmem>>, vector<8x8x128xf32>
    %101 = vector.shape_cast %100 : vector<8x8x128xf32> to vector<64x128xf32>
    %102 = arith.truncf %101 : vector<64x128xf32> to vector<64x128xbf16>
    %c0_118 = arith.constant 0 : index
    %c128_119 = arith.constant 128 : index
    %103 = vector.load %arg8[%c0_118, %c128_119] : memref<64x1152xbf16, #tpu.memory_space<vmem>>, vector<64x128xbf16>
    tpu.vector_store %arg8[%c0_118, %c128_119], %102 {strides = array<i32>} : memref<64x1152xbf16, #tpu.memory_space<vmem>>, vector<64x128xbf16>,
    %c0_120 = arith.constant 0 : index
    %c2_121 = arith.constant 2 : index
    %c0_122 = arith.constant 0 : index
    %104 = vector.load %arg7[%c0_120, %c2_121, %c0_122] : memref<10x10x128xf32, #tpu.memory_space<vmem>>, vector<8x8x128xf32>
    %105 = vector.shape_cast %104 : vector<8x8x128xf32> to vector<64x128xf32>
    %106 = arith.truncf %105 : vector<64x128xf32> to vector<64x128xbf16>
    %c0_123 = arith.constant 0 : index
    %c256_124 = arith.constant 256 : index
    %107 = vector.load %arg8[%c0_123, %c256_124] : memref<64x1152xbf16, #tpu.memory_space<vmem>>, vector<64x128xbf16>
    tpu.vector_store %arg8[%c0_123, %c256_124], %106 {strides = array<i32>} : memref<64x1152xbf16, #tpu.memory_space<vmem>>, vector<64x128xbf16>,
    %c1_125 = arith.constant 1 : index
    %c0_126 = arith.constant 0 : index
    %c0_127 = arith.constant 0 : index
    %108 = vector.load %arg7[%c1_125, %c0_126, %c0_127] : memref<10x10x128xf32, #tpu.memory_space<vmem>>, vector<8x8x128xf32>
    %109 = vector.shape_cast %108 : vector<8x8x128xf32> to vector<64x128xf32>
    %110 = arith.truncf %109 : vector<64x128xf32> to vector<64x128xbf16>
    %c0_128 = arith.constant 0 : index
    %c384_129 = arith.constant 384 : index
    %111 = vector.load %arg8[%c0_128, %c384_129] : memref<64x1152xbf16, #tpu.memory_space<vmem>>, vector<64x128xbf16>
    tpu.vector_store %arg8[%c0_128, %c384_129], %110 {strides = array<i32>} : memref<64x1152xbf16, #tpu.memory_space<vmem>>, vector<64x128xbf16>,
    %c1_130 = arith.constant 1 : index
    %c1_131 = arith.constant 1 : index
    %c0_132 = arith.constant 0 : index
    %112 = vector.load %arg7[%c1_130, %c1_131, %c0_132] : memref<10x10x128xf32, #tpu.memory_space<vmem>>, vector<8x8x128xf32>
    %113 = vector.shape_cast %112 : vector<8x8x128xf32> to vector<64x128xf32>
    %114 = arith.truncf %113 : vector<64x128xf32> to vector<64x128xbf16>
    %c0_133 = arith.constant 0 : index
    %c512_134 = arith.constant 512 : index
    %115 = vector.load %arg8[%c0_133, %c512_134] : memref<64x1152xbf16, #tpu.memory_space<vmem>>, vector<64x128xbf16>
    tpu.vector_store %arg8[%c0_133, %c512_134], %114 {strides = array<i32>} : memref<64x1152xbf16, #tpu.memory_space<vmem>>, vector<64x128xbf16>,
    %c1_135 = arith.constant 1 : index
    %c2_136 = arith.constant 2 : index
    %c0_137 = arith.constant 0 : index
    %116 = vector.load %arg7[%c1_135, %c2_136, %c0_137] : memref<10x10x128xf32, #tpu.memory_space<vmem>>, vector<8x8x128xf32>
    %117 = vector.shape_cast %116 : vector<8x8x128xf32> to vector<64x128xf32>
    %118 = arith.truncf %117 : vector<64x128xf32> to vector<64x128xbf16>
    %c0_138 = arith.constant 0 : index
    %c640_139 = arith.constant 640 : index
    %119 = vector.load %arg8[%c0_138, %c640_139] : memref<64x1152xbf16, #tpu.memory_space<vmem>>, vector<64x128xbf16>
    tpu.vector_store %arg8[%c0_138, %c640_139], %118 {strides = array<i32>} : memref<64x1152xbf16, #tpu.memory_space<vmem>>, vector<64x128xbf16>,
    %c2_140 = arith.constant 2 : index
    %c0_141 = arith.constant 0 : index
    %c0_142 = arith.constant 0 : index
    %120 = vector.load %arg7[%c2_140, %c0_141, %c0_142] : memref<10x10x128xf32, #tpu.memory_space<vmem>>, vector<8x8x128xf32>
    %121 = vector.shape_cast %120 : vector<8x8x128xf32> to vector<64x128xf32>
    %122 = arith.truncf %121 : vector<64x128xf32> to vector<64x128xbf16>
    %c0_143 = arith.constant 0 : index
    %c768_144 = arith.constant 768 : index
    %123 = vector.load %arg8[%c0_143, %c768_144] : memref<64x1152xbf16, #tpu.memory_space<vmem>>, vector<64x128xbf16>
    tpu.vector_store %arg8[%c0_143, %c768_144], %122 {strides = array<i32>} : memref<64x1152xbf16, #tpu.memory_space<vmem>>, vector<64x128xbf16>,
    %c2_145 = arith.constant 2 : index
    %c1_146 = arith.constant 1 : index
    %c0_147 = arith.constant 0 : index
    %124 = vector.load %arg7[%c2_145, %c1_146, %c0_147] : memref<10x10x128xf32, #tpu.memory_space<vmem>>, vector<8x8x128xf32>
    %125 = vector.shape_cast %124 : vector<8x8x128xf32> to vector<64x128xf32>
    %126 = arith.truncf %125 : vector<64x128xf32> to vector<64x128xbf16>
    %c0_148 = arith.constant 0 : index
    %c896_149 = arith.constant 896 : index
    %127 = vector.load %arg8[%c0_148, %c896_149] : memref<64x1152xbf16, #tpu.memory_space<vmem>>, vector<64x128xbf16>
    tpu.vector_store %arg8[%c0_148, %c896_149], %126 {strides = array<i32>} : memref<64x1152xbf16, #tpu.memory_space<vmem>>, vector<64x128xbf16>,
    %c2_150 = arith.constant 2 : index
    %c2_151 = arith.constant 2 : index
    %c0_152 = arith.constant 0 : index
    %128 = vector.load %arg7[%c2_150, %c2_151, %c0_152] : memref<10x10x128xf32, #tpu.memory_space<vmem>>, vector<8x8x128xf32>
    %129 = vector.shape_cast %128 : vector<8x8x128xf32> to vector<64x128xf32>
    %130 = arith.truncf %129 : vector<64x128xf32> to vector<64x128xbf16>
    %c0_153 = arith.constant 0 : index
    %c1024_154 = arith.constant 1024 : index
    %131 = vector.load %arg8[%c0_153, %c1024_154] : memref<64x1152xbf16, #tpu.memory_space<vmem>>, vector<64x128xbf16>
    tpu.vector_store %arg8[%c0_153, %c1024_154], %130 {strides = array<i32>} : memref<64x1152xbf16, #tpu.memory_space<vmem>>, vector<64x128xbf16>,
    %c0_155 = arith.constant 0 : index
    %c0_156 = arith.constant 0 : index
    %132 = vector.load %arg8[%c0_155, %c0_156] : memref<64x1152xbf16, #tpu.memory_space<vmem>>, vector<64x1152xbf16>
    %c1_157 = arith.constant 1 : index
    %c0_158 = arith.constant 0 : index
    %c0_159 = arith.constant 0 : index
    %133 = vector.load %arg3[%c1_157, %c0_158, %c0_159] : memref<2x1152x128xbf16, #tpu.memory_space<vmem>>, vector<1x1152x128xbf16>
    %134 = vector.shape_cast %133 : vector<1x1152x128xbf16> to vector<1152x128xbf16>
    %cst_160 = arith.constant dense<0.000000e+00> : vector<64x128xf32>
    %135 = tpu.matmul %132, %134, %cst_160 {dimension_numbers = #tpu.dot_dimension_numbers<[1], [0], [0], [1], [0, 0, 1, 1], [], []>} : vector<64x1152xbf16>, vector<1152x128xbf16>, vector<64x128xf32> -> vector<64x128xf32>
    %c2_161 = arith.constant 2 : index
    %c0_162 = arith.constant 0 : index
    %c0_163 = arith.constant 0 : index
    %136 = vector.load %arg5[%c2_161, %c0_162, %c0_163] : memref<3x1x128xf32, #tpu.memory_space<vmem>>, vector<1x1x128xf32>
    %137 = vector.shape_cast %136 : vector<1x1x128xf32> to vector<1x128xf32>
    %138 = vector.broadcast %137 : vector<1x128xf32> to vector<64x128xf32>
    %139 = arith.addf %135, %138 : vector<64x128xf32>
    %140 = vector.shape_cast %139 : vector<64x128xf32> to vector<8x8x128xf32>
    %141 = arith.addf %7, %140 : vector<8x8x128xf32>
    %142 = arith.addf %141, %92 : vector<8x8x128xf32>
    %c0_164 = arith.constant 0 : index
    %c0_165 = arith.constant 0 : index
    %c0_166 = arith.constant 0 : index
    %c0_167 = arith.constant 0 : index
    %143 = vector.load %arg6[%c0_164, %c0_165, %c0_166, %c0_167] : memref<1x8x8x128xf32, #tpu.memory_space<vmem>>, vector<1x8x8x128xf32>
    %144 = vector.shape_cast %143 : vector<1x8x8x128xf32> to vector<8x8x128xf32>
    %145 = vector.shape_cast %142 : vector<8x8x128xf32> to vector<1x8x8x128xf32>
    tpu.vector_store %arg6[%c0_164, %c0_165, %c0_166, %c0_167], %145 {strides = array<i32>} : memref<1x8x8x128xf32, #tpu.memory_space<vmem>>, vector<1x8x8x128xf32>,
    return
  }
  func.func @transform_0(%arg0: i32) -> (i32, i32, i32, i32) {
    %c0_i32 = arith.constant 0 : i32
    %c0_i32_0 = arith.constant 0 : i32
    %c0_i32_1 = arith.constant 0 : i32
    %c0_i32_2 = arith.constant 0 : i32
    return %arg0, %c0_i32, %c0_i32_0, %c0_i32_1 : i32, i32, i32, i32
  }
  func.func @transform_1(%arg0: i32) -> (i32, i32, i32, i32) {
    %c0_i32 = arith.constant 0 : i32
    %c0_i32_0 = arith.constant 0 : i32
    %c0_i32_1 = arith.constant 0 : i32
    %c0_i32_2 = arith.constant 0 : i32
    %c0_i32_3 = arith.constant 0 : i32
    return %c0_i32, %c0_i32_0, %c0_i32_1, %c0_i32_2 : i32, i32, i32, i32
  }
  func.func @transform_2(%arg0: i32) -> (i32, i32, i32) {
    %c0_i32 = arith.constant 0 : i32
    %c0_i32_0 = arith.constant 0 : i32
    %c0_i32_1 = arith.constant 0 : i32
    %c0_i32_2 = arith.constant 0 : i32
    return %c0_i32, %c0_i32_0, %c0_i32_1 : i32, i32, i32
  }
  func.func @transform_3(%arg0: i32) -> (i32, i32, i32) {
    %c0_i32 = arith.constant 0 : i32
    %c0_i32_0 = arith.constant 0 : i32
    %c0_i32_1 = arith.constant 0 : i32
    %c0_i32_2 = arith.constant 0 : i32
    return %c0_i32, %c0_i32_0, %c0_i32_1 : i32, i32, i32
  }
  func.func @transform_4(%arg0: i32) -> (i32, i32, i32) {
    %c0_i32 = arith.constant 0 : i32
    %c0_i32_0 = arith.constant 0 : i32
    %c0_i32_1 = arith.constant 0 : i32
    %c0_i32_2 = arith.constant 0 : i32
    return %c0_i32, %c0_i32_0, %c0_i32_1 : i32, i32, i32
  }
  func.func @transform_5(%arg0: i32) -> (i32, i32, i32, i32) {
    %c0_i32 = arith.constant 0 : i32
    %c0_i32_0 = arith.constant 0 : i32
    %c0_i32_1 = arith.constant 0 : i32
    %c0_i32_2 = arith.constant 0 : i32
    return %arg0, %c0_i32, %c0_i32_0, %c0_i32_1 : i32, i32, i32, i32
  }
}

</mosaic_0001>

<bundles_post_ra>
// kernel: tpu_custom_call.1
= control target key start
LH: loop header
LB: loop body
LE: loop exit
PB: predicated region body
PF: predicated region fallthrough
CT: control target
= control target key end

     0   :  { %10 = vsyncpa [#allocation5], 0  ;;  %s6024_s0 = inlined_call_operand.hbm [shape: f32[2,8,8,128], index: 0, kind: input, shape index: {}]   ;;  %s6025_s1 = inlined_call_operand.vmem [shape: f32[1,8,8,1], index: 1, kind: input, shape index: {}]   ;;  %s6026_s2 = inlined_call_operand.hbm [shape: bf16[2,1152,128], index: 2, kind: input, shape index: {}]   ;;  %s6027_s3 = inlined_call_operand.vmem [shape: bf16[1,128,128], index: 3, kind: input, shape index: {}]   ;;  %s6028_s4 = inlined_call_operand.vmem [shape: f32[3,1,128], index: 4, kind: input, shape index: {}]   ;;  %s6029_s5 = inlined_call_operand.hbm [shape: f32[2,8,8,128], index: 5, kind: output, shape index: {}]  }
   0x1   :  { %12 = vsyncpa [#allocation5 + $0x1], 0 }
   0x2   :  { %13 = vsyncpa [#allocation8], 0 }
   0x3   :  { %14 = vsyncpa [#allocation6], 0 }
   0x4   :  { %16 = vsyncpa [#allocation6 + $0x1], 0  ;;  %s5403_s18 = smov 0   ;;  %s5405_s19 = smov 0  }
   0x5   :  { %s5407_s20 = smov 0   ;;  %s5409_s21 = smov 0  }
   0x6 LB: > { %s5424_s22 = sadd.s32 4294967295, %s5360_s21   ;;  %s3934_s23 = sadd.s32 4294967294, %s5360_s21   ;;  %s5360_s21 = sphi %s5409_s21, %s6089_s21   ;;  %s5356_s20 = sphi %s5407_s20, %s6088_s20   ;;  %s5352_s19 = sphi %s5405_s19, %s6087_s19   ;;  %s5348_s18 = sphi %s5403_s18, %s6086_s18  }
   0x7   : > { %p42_p0 = scmp.ne.s32.totalorder %s5352_s19, %s5348_s18  ;;  %p6030_p1 = scmp.eq.s32.totalorder %s5424_s22, 0 }
   0x8   : > { %p156_p3 = scmp.eq.s32.totalorder %s3934_s23, 1  ;;  %p3935_p5 = scmp.ge.s32.totalorder %s5360_s21, 1 }
   0x9   : > { %p5433_p4 = por %p6030_p1, %p42_p0  ;;  %p163_p7 = scmp.lt.s32.totalorder %s5360_s21, 3 }
   0xa   : > { %p5438_p6 = por %p156_p3, %p42_p0  ;;  %s5362_s27 = smov [#allocation7]  }
   0xb   : > { %s6034_s24 = scalar_select %p5433_p4, 1, 0 }
   0xc   : > { %s6035_s25 = scalar_select %p5438_p6, 1, 0 }
   0xd   : > { %p5443_p8 = pnand %p3935_p5, %p163_p7  ;;  %s178_s28 = sshll.u32 %s5362_s27, 4  ;;  %s179_s28 = int_to_ptr.vmem [resolvable:$true] %s178_s28 }
   0xe   : > { %s5457_s30 = sadd.s32 1, %s5360_s21   ;;  %s29_s6 = sadd.s32 1, %s5356_s20 }
   0xf   : > { %s6036_s26 = scalar_select %p5443_p8, 1, 0 }
  0x10   : > { %p4921_p9 = pneg %p5443_p8  ;;  %s26_s7 = ssub.s32 %s5360_s21, %s5457_s30 }
  0x11   : > { %s5249_s8 = scalar_lea.vmem %s179_s28, 18432  ;;  %p5257_p5 = scmp.lt.s32.totalorder %s179_s28, %s179_s28 }
  0x12   : > { %p5452_p11 = pnand %p4921_p9, %p6030_p1  ;;  %p5250_p13 = scmp.ne.s32.totalorder %s179_s28, %s5249_s8 }
  0x13   : > { %p5258_p7 = scmp.lt.s32.totalorder %s5249_s8, %s5249_s8 }
  0x14   : > { %p5240_p12 = pneg %p5452_p11 }
  0x15   : > { %p5259_p10 = por %p5258_p7, %p5257_p5 }
  0x16   : > { %p5252_p0 = pnand %p5250_p13, %p5240_p12 }
  0x18   : > { %p5253_p3 = pneg %p5252_p0 }
  0x1a   : > { %p5260_p2 = pnand %p5259_p10, %p5253_p3 }
  0x1c   : > { %5263 = shalt.err (!%p5260_p2)
}
  0x1d   : > { %s5363_s9 = smov 64   ;;  %s5364_s10 = smov 4  }
  0x1e   : > { %4924 = dma.hbm_to_vmem [thread:$0]  (!%p5452_p11), %s6026_s2, 18432, %s179_s28, [#allocation8], %s5363_s9, %s5363_s9, %s5364_s10  }
  0x1f   : > { %p27_p9 = scmp.eq.s32.totalorder %s26_s7, 0  ;;  %p36_p12 = scmp.ne.s32.totalorder %s5356_s20, %s5352_s19 }
  0x20   : > { %p37_p10 = scmp.eq.s32.totalorder %s5360_s21, 0  ;;  %p4934_p2 = scmp.lt.s32.totalorder %s5360_s21, 2 }
  0x21   : > { %s5474_s13 = scalar_select %p27_p9, %s5356_s20, %s29_s6  }
  0x22   : > { %p38_p13 = por %p37_p10, %p36_p12  ;;  %p6038_p0 = scmp.eq.s32.totalorder %s5424_s22, 1 }
  0x23   : > { %s198_s15 = sand.u32 1, %s5356_s20   ;;  %s4323_s16 = sshll.u32 %s5360_s21, 10 }
  0x24   : > { %p5478_p3 = por %p6038_p0, %p36_p12  ;;  %s3938_s17 = sshll.u32 %s198_s15, 6 }
  0x25   : > { %s5487_s29 = scalar_lea.hbm %s6024_s0, %s4323_s16  ;;  %s202_s28 = scalar_lea.vmem [#allocation4], %s3938_s17 }
  0x26   : > { %s6039_s14 = scalar_select %p5478_p3, 1, 0 }
  0x27   : > { %s209_s6 = sshll.u32 %s202_s28, 4  ;;  %p5489_p11 = pnand %p4934_p2, %p38_p13  ;;  %s5493_s6 = int_to_ptr.vmem [resolvable:$true] %s209_s6 }
  0x28   : > { %s5495_s8 = scalar_lea.sflag [#allocation5], %s198_s15  ;;  %s5264_s9 = scalar_lea.hbm %s5487_s29, 1024 }
  0x29   : > { %p5265_p5 = scmp.ne.s32.totalorder %s5487_s29, %s5264_s9  ;;  %p5266_p7 = pneg %p5489_p11 }
  0x2a   : > { %s5269_s12 = scalar_lea.hbm %s6024_s0, 2048  ;;  %p5270_p10 = scmp.lt.s32.totalorder %s5487_s29, %s6024_s0 }
  0x2b   : > { %p5267_p9 = pnand %p5266_p7, %p5265_p5  ;;  %p5271_p2 = scmp.lt.s32.totalorder %s5269_s12, %s5264_s9 }
  0x2d   : > { %p5268_p12 = pneg %p5267_p9  ;;  %p5272_p13 = por %p5271_p2, %p5270_p10 }
  0x2f   : > { %p5273_p0 = pnand %p5272_p13, %p5268_p12 }
  0x31   : > { %5276 = shalt.err (!%p5273_p0)
}
  0x32   : > { %s5277_s15 = scalar_lea.vmem %s5493_s6, 1024  ;;  %s5365_s23 = smov [#allocation4]  }
  0x33   : > { %p5278_p1 = scmp.ne.s32.totalorder %s5493_s6, %s5277_s15  ;;  %s5282_s27 = sshll.u32 %s5365_s23, 4  ;;  %s5283_s27 = int_to_ptr.vmem [resolvable:$false] %s5282_s27 }
  0x34   : > { %s5284_s28 = scalar_lea.vmem %s5283_s27, 2048  ;;  %p5285_p9 = scmp.lt.s32.totalorder %s5493_s6, %s5283_s27 }
  0x35   : > { %p5280_p6 = pnand %p5278_p1, %p5266_p7  ;;  %p5286_p3 = scmp.lt.s32.totalorder %s5284_s28, %s5277_s15 }
  0x37   : > { %p5281_p5 = pneg %p5280_p6  ;;  %p5287_p4 = por %p5286_p3, %p5285_p9 }
  0x39   : > { %p5288_p8 = pnand %p5287_p4, %p5281_p5 }
  0x3b   : > { %5291 = shalt.err (!%p5288_p8)
}
  0x3c   : > { %s5366_s9 = smov 128   ;;  %s5367_s10 = smov 8  }
  0x3d   : > { %4928 = dma.hbm_to_vmem [thread:$0]  (!%p5489_p11), %s5487_s29, 1024, %s5493_s6, %s5495_s8, %s5366_s9, %s5366_s9, %s5367_s10  }
  0x3e   : > { %p6041_p1 = scmp.ne.s32.totalorder %s6036_s26, 0 }
  0x40   : > { %221 = sbr.rel (%p6041_p1) target bundleno = 699 (0x2bb), region = 40 }
  0x45   : > { %s5519_s11 = sand.u32 1, %s5352_s19   ;;  %p6042_p4 = scmp.ne.s32.totalorder %s6034_s24, 0 }
  0x46   : > { %s3942_s12 = sshll.u32 %s5519_s11, 6  ;;  %s224_s16 = scalar_lea.sflag [#allocation5], %s5519_s11 }
  0x47   : > { %s5525_s17 = scalar_lea.vmem [#allocation4], %s3942_s12 }
  0x48   : > { %5335 = dma.done.wait (%p6042_p4), %s224_s16, 1024  }
  0x49   : > { %5337 = vsyncadd (%p6042_p4), %s224_s16, 4294966272  ;;  %p6043_p6 = scmp.eq.s32.totalorder %s5424_s22, 0 }
  0x4b   : > { %5339 = dma.done.wait (%p6043_p6), [#allocation8], 18432   ;;  %p6044_p8 = pmov %p6043_p6 }
  0x4c   : > { %v5368_v0 = vmov 0.0   ;;  %v4980_v1 = vld [vmem:[#allocation7 + $0x78] sm:$0xff]   ;;  %v4984_v5 = vld [vmem:[#allocation7 + $0x70] sm:$0xff]   ;;  %v4988_v9 = vld [vmem:[#allocation7 + $0x68] sm:$0xff]   ;;  %v5369_v16 = vmov 0   ;;  %s5946_s16 = scalar_lea.vmem [#allocation9], %s3942_s12 }
  0x4d   : > { %5341 = vsyncadd (%p6044_p8), [#allocation8], 4294948864  ;;  %259 = vst [vmem:[#allocation2] sm:$0xff] %v5368_v0  ;;  %v4981_v2 = vld [vmem:[#allocation7 + $0x38] sm:$0xff]   ;;  %4469 = vmatprep.subr.bf16.mxu0 %v4980_v1  ;;  %v4985_v6 = vld [vmem:[#allocation7 + $0x30] sm:$0xff]   ;;  %4979 = vset.pattern.permute.xlu1 %v5369_v16  ;;  %s4468_s26 = sshll.u32 %s5424_s22, 10 }
  0x4e   : > { %260 = vst [vmem:[#allocation2 + $0x8] sm:$0x3] %v5368_v0  ;;  %265 = vst [vmem:[#allocation2 + $0x10] sm:$0x1] %v5368_v0  ;;  %v4982_v3 = vld [vmem:[#allocation7 + $0xf8] sm:$0xff]   ;;  %4470 = vmatpush3.bf16.msra.mxu0 %v4981_v2  ;;  %v4986_v7 = vld [vmem:[#allocation7 + $0xf0] sm:$0xff]   ;;  %4978 = vset.pattern.permute.xlu0 %v5369_v16  ;;  %s5977_s8 = scalar_lea.hbm %s6029_s5, %s4468_s26 }
  0x4f   : > { %262 = vst [vmem:[#allocation2 + $0x90] sm:$0xff] %v5368_v0  ;;  %263 = vst [vmem:[#allocation2 + $0x98] sm:$0x3] %v5368_v0  ;;  %v4983_v4 = vld [vmem:[#allocation7 + $0xb8] sm:$0xff]   ;;  %4509 = vmatprep.subr.bf16.mxu1 %v4982_v3  ;;  %4471 = vmatprep.subr.bf16.mxu0 %v4984_v5  ;;  %v4987_v8 = vld [vmem:[#allocation7 + $0xb0] sm:$0xff]   ;;  %s3851_s29 = sshll.u32 %s5946_s16, 4  ;;  %s5979_s29 = int_to_ptr.vmem [resolvable:$true] %s3851_s29 }
  0x50   : > { %266 = vst [vmem:[#allocation2 + $0x20] sm:$0x1] %v5368_v0  ;;  %267 = vst [vmem:[#allocation2 + $0x30] sm:$0x1] %v5368_v0  ;;  %4510 = vmatpush3.bf16.msra.mxu1 %v4983_v4  ;;  %v4989_v10 = vld [vmem:[#allocation7 + $0x28] sm:$0xff]   ;;  %v4992_v13 = vld [vmem:[#allocation7 + $0x60] sm:$0xff]  }
  0x51   : > { %268 = vst [vmem:[#allocation2 + $0x40] sm:$0x1] %v5368_v0  ;;  %269 = vst [vmem:[#allocation2 + $0x50] sm:$0x1] %v5368_v0  ;;  %4511 = vmatprep.subr.bf16.mxu1 %v4986_v7  ;;  %v4990_v11 = vld [vmem:[#allocation7 + $0xe8] sm:$0xff]   ;;  %v4993_v14 = vld [vmem:[#allocation7 + $0x20] sm:$0xff]  }
  0x52   : > { %270 = vst [vmem:[#allocation2 + $0x60] sm:$0x1] %v5368_v0  ;;  %271 = vst [vmem:[#allocation2 + $0x70] sm:$0x1] %v5368_v0  ;;  %4472 = vmatpush3.bf16.msra.mxu0 %v4985_v6  ;;  %v4991_v12 = vld [vmem:[#allocation7 + $0xa8] sm:$0xff]   ;;  %v4994_v15 = vld [vmem:[#allocation7 + $0xe0] sm:$0xff]  }
  0x53   : > { %272 = vst [vmem:[#allocation2 + $0x80] sm:$0x1] %v5368_v0  ;;  %275 = vst [vmem:[#allocation2 + $0x19] sm:$0x1] %v5368_v0  ;;  %4473 = vmatprep.subr.bf16.mxu0 %v4988_v9  ;;  %v4995_v17 = vld [vmem:[#allocation7 + $0xa0] sm:$0xff]   ;;  %v4996_v18 = vld [vmem:[#allocation7 + $0x58] sm:$0xff]  }
  0x54   : > { %276 = vst [vmem:[#allocation2 + $0x29] sm:$0x1] %v5368_v0  ;;  %277 = vst [vmem:[#allocation2 + $0x39] sm:$0x1] %v5368_v0  ;;  %4512 = vmatpush3.bf16.msra.mxu1 %v4987_v8  ;;  %v4997_v19 = vld [vmem:[#allocation7 + $0x18] sm:$0xff]   ;;  %v5000_v22 = vld [vmem:[#allocation7 + $0x50] sm:$0xff]  }
  0x55   : > { %278 = vst [vmem:[#allocation2 + $0x49] sm:$0x1] %v5368_v0  ;;  %279 = vst [vmem:[#allocation2 + $0x59] sm:$0x1] %v5368_v0  ;;  %4513 = vmatprep.subr.bf16.mxu1 %v4990_v11  ;;  %v4998_v20 = vld [vmem:[#allocation7 + $0xd8] sm:$0xff]   ;;  %v5001_v23 = vld [vmem:[#allocation7 + $0x10] sm:$0xff]  }
  0x56   : > { %280 = vst [vmem:[#allocation2 + $0x69] sm:$0x1] %v5368_v0  ;;  %281 = vst [vmem:[#allocation2 + $0x79] sm:$0x1] %v5368_v0  ;;  %4474 = vmatpush3.bf16.msra.mxu0 %v4989_v10  ;;  %v4999_v21 = vld [vmem:[#allocation7 + $0x98] sm:$0xff]   ;;  %v5002_v24 = vld [vmem:[#allocation7 + $0xd0] sm:$0xff]  }
  0x57   : > { %282 = vst [vmem:[#allocation2 + $0x89] sm:$0x1] %v5368_v0  ;;  %264 = vst [vmem:[#allocation2] sm:$0x1] %v5368_v0  ;;  %4475 = vmatprep.subr.bf16.mxu0 %v4992_v13  ;;  %v5003_v25 = vld [vmem:[#allocation7 + $0x90] sm:$0xff]   ;;  %v5004_v26 = vld [vmem:[#allocation7 + $0x48] sm:$0xff]  }
  0x58   : > { %274 = vst [vmem:[#allocation2 + $0x9] sm:$0x1] %v5368_v0  ;;  %273 = vst [vmem:[#allocation2 + $0x90] sm:$0x1] %v5368_v0  ;;  %4514 = vmatpush3.bf16.msra.mxu1 %v4991_v12  ;;  %v5005_v27 = vld [vmem:[#allocation7 + $0x8] sm:$0xff]   ;;  %v5008_v30 = vld [vmem:[#allocation7 + $0x40] sm:$0xff]  }
  0x59   : > { %283 = vst [vmem:[#allocation2 + $0x99] sm:$0x1] %v5368_v0  ;;  %4515 = vmatprep.subr.bf16.mxu1 %v4994_v15  ;;  %v5006_v28 = vld [vmem:[#allocation7 + $0xc8] sm:$0xff]   ;;  %v5009_v31 = vld [vmem:[#allocation7] sm:$0xff]   ;;  %v5014_v40 = vld [vmem:[#allocation7 + $0x178] sm:$0xff]   ;;  %s3838_s22 = scalar_lea.sflag [#allocation6], %s5519_s11 }
  0x5a   : > { %4476 = vmatpush3.bf16.msra.mxu0 %v4993_v14  ;;  %v5007_v29 = vld [vmem:[#allocation7 + $0x88] sm:$0xff]   ;;  %v5010_v32 = vld [vmem:[#allocation7 + $0xc0] sm:$0xff]   ;;  %v5018_v46 = vld [vmem:[#allocation7 + $0x1f8] sm:$0xff]   ;;  %s5292_s15 = scalar_lea.vmem %s5979_s29, 1024  ;;  %p6083_p11 = scmp.ne.s32.totalorder %s6039_s14, 0 }
  0x5b   : > { %4477 = vmatprep.subr.bf16.mxu0 %v4996_v18  ;;  %v284_v33 = vld [vmem:[%s5525_s17] sm:$0xff]  ;;  %v285_v42 = vld [vmem:[%s5525_s17 + $0x8] sm:$0xff]  ;;  %v286_v49 = vld [vmem:[%s5525_s17 + $0x10] sm:$0xff]  ;;  %p5293_p3 = scmp.ne.s32.totalorder %s5979_s29, %s5292_s15 }
  0x5c   : > { %4516 = vmatpush3.bf16.msra.mxu1 %v4995_v17  ;;  %v357_v35 = vld [vmem:[#allocation2 + $0x1] sm:$0xff]  ;;  %v5536_v36 = vmax.f32 %v284_v33, 0.0  ;;  %v5548_v44 = vmax.f32 %v285_v42, 0.0  ;;  %v5559_v52 = vmax.f32 %v286_v49, 0.0  ;;  %v287_v57 = vld [vmem:[%s5525_s17 + $0x18] sm:$0xff]  ;;  %v5020_v6 = vld [vmem:[#allocation7 + $0x170] sm:$0xff]  }
  0x5d   : > { %4517 = vmatprep.subr.bf16.mxu1 %v4998_v20  ;;  %v5540_v38 = vpack.c.bf16 %v357_v35, %v357_v35  ;;  %v5013_v39 = vld [vmem:[#allocation7 + $0x80] sm:$0xff]   ;;  %v5565_v60 = vmax.f32 %v287_v57, 0.0  ;;  %v5017_v1 = vld [vmem:[#allocation7 + $0x138] sm:$0xff]   ;;  %v5021_v13 = vld [vmem:[#allocation7 + $0x130] sm:$0xff]   ;;  %p5294_p7 = pnand %p5293_p3, %p6083_p11 }
  0x5e   : > { %4478 = vmatpush3.bf16.msra.mxu0 %v4997_v19  ;;  %v309_v34 = vld [vmem:[#allocation2] sm:$0xff]  ;;  %301 = vst [vmem:[#allocation2 + $0x11] sm:$0xff] %v5536_v36  ;;  %v4333_v41 = vpack.c.bf16 %v5536_v36, %v5536_v36  ;;  %302 = vst [vmem:[#allocation2 + $0x21] sm:$0xff] %v5548_v44  ;;  %v4334_v47 = vpack.c.bf16 %v5548_v44, %v5548_v44  ;;  %v1874_v48 = vpack.c.bf16 %v5548_v44, %v5536_v36  ;;  %v5019_v11 = vld [vmem:[#allocation7 + $0x1b8] sm:$0xff]  }
  0x5f   : > { %4479 = vmatprep.subr.bf16.mxu0 %v5000_v22  ;;  %v5538_v37 = vpack.c.bf16 %v309_v34, %v309_v34  ;;  %397 = vst [vmem:[#allocation3 + $0x4] sm:$0xf] %v5540_v38  ;;  %v405_v43 = vld [vmem:[#allocation2 + $0x2] sm:$0xff]  ;;  %303 = vst [vmem:[#allocation2 + $0x31] sm:$0xff] %v5559_v52  ;;  %v4335_v55 = vpack.c.bf16 %v5559_v52, %v5559_v52  ;;  %v4336_v62 = vpack.c.bf16 %v5565_v60, %v5565_v60  ;;  %v5022_v14 = vld [vmem:[#allocation7 + $0x1f0] sm:$0xff]   ;;  %p5295_p12 = pneg %p5294_p7 }
  0x60   : > { %4518 = vmatpush3.bf16.msra.mxu1 %v4999_v21  ;;  %v5550_v45 = vpack.c.bf16 %v405_v43, %v405_v43  ;;  %398 = vst [vmem:[#allocation3 + $0x28] sm:$0xf] %v4333_v41  ;;  %541 = vst [vmem:[#allocation3 + $0x10] sm:$0xf] %v4333_v41  ;;  %v1875_v63 = vpack.c.bf16 %v5565_v60, %v5559_v52  ;;  %v288_v12 = vld [vmem:[%s5525_s17 + $0x20] sm:$0xff]  ;;  %v5027_v21 = vld [vmem:[#allocation7 + $0x168] sm:$0xff]  }
  0x61   : > { %4519 = vmatprep.subr.bf16.mxu1 %v5002_v24  ;;  %349 = vst [vmem:[#allocation3] sm:$0xf] %v5538_v37  ;;  %399 = vst [vmem:[#allocation3 + $0x4c] sm:$0xf] %v4334_v47  ;;  %v5575_v15 = vmax.f32 %v288_v12, 0.0  ;;  %v5033_v35 = vld [vmem:[#allocation7 + $0x1a8] sm:$0xff]  }
  0x62   : > { %4480 = vmatpush3.bf16.msra.mxu0 %v5001_v23  ;;  %445 = vst [vmem:[#allocation3 + $0x8] sm:$0xf] %v5550_v45  ;;  %542 = vst [vmem:[#allocation3 + $0x34] sm:$0xf] %v4334_v47  ;;  %v289_v23 = vld [vmem:[%s5525_s17 + $0x28] sm:$0xff]  ;;  %v5039_v43 = vld [vmem:[#allocation7 + $0x1a0] sm:$0xff]  }
  0x63   : > { %4481 = vmatprep.subr.bf16.mxu0 %v5004_v26  ;;  %686 = vst [vmem:[#allocation3 + $0x1c] sm:$0xf] %v4334_v47  ;;  %400 = vst [vmem:[#allocation3 + $0x70] sm:$0xf] %v4335_v55  ;;  %v4337_v20 = vpack.c.bf16 %v5575_v15, %v5575_v15  ;;  %v5582_v26 = vmax.f32 %v289_v23, 0.0  ;;  %v5048_v57 = vld [vmem:[#allocation7 + $0x150] sm:$0xff]  }
  0x64   : > { %4520 = vmatpush3.bf16.msra.mxu1 %v5003_v25  ;;  %687 = vst [vmem:[#allocation3 + $0x40] sm:$0xf] %v4335_v55  ;;  %543 = vst [vmem:[#allocation3 + $0x58] sm:$0xf] %v4335_v55  ;;  %v5025_v25 = vld [vmem:[#allocation7 + $0x1b0] sm:$0xff]   ;;  %v5063_v23 = vld [vmem:[#allocation7 + $0x100] sm:$0xff]  }
  0x65   : > { %4521 = vmatprep.subr.bf16.mxu1 %v5006_v28  ;;  %v310_v50 = vld [vmem:[#allocation2 + $0x10] sm:$0xff]  ;;  %v454_v56 = vld [vmem:[#allocation2 + $0x20] sm:$0xff]  ;;  %304 = vst [vmem:[#allocation2 + $0x41] sm:$0xff] %v5565_v60  ;;  %401 = vst [vmem:[#allocation3 + $0x94] sm:$0xf] %v4336_v62 }
  0x66   : > { %4482 = vmatpush3.bf16.msra.mxu0 %v5005_v27  ;;  %v406_v51 = vld [vmem:[#allocation2 + $0x12] sm:$0xff]  ;;  %v4325_v53 = vpack.c.bf16 %v310_v50, %v310_v50  ;;  %v407_v58 = vld [vmem:[#allocation2 + $0x22] sm:$0xff]  ;;  %v4349_v59 = vpack.c.bf16 %v454_v56, %v454_v56  ;;  %544 = vst [vmem:[#allocation3 + $0x7c] sm:$0xf] %v4336_v62  ;;  %688 = vst [vmem:[#allocation3 + $0x64] sm:$0xf] %v4336_v62 }
  0x67   : > { %4483 = vmatprep.subr.bf16.mxu0 %v5008_v30  ;;  %v4341_v54 = vpack.c.bf16 %v406_v51, %v406_v51  ;;  %v4342_v61 = vpack.c.bf16 %v407_v58, %v407_v58  ;;  %v312_v2 = vld [vmem:[#allocation2 + $0x30] sm:$0xff]  ;;  %v5011_v5 = vld [vmem:[#allocation3 + $0x4] ss:$36 sps:$4 sm:$0xff]   ;;  %305 = vst [vmem:[#allocation2 + $0x51] sm:$0xff] %v5575_v15  ;;  %402 = vst [vmem:[#allocation3 + $0xb8] sm:$0xf] %v4337_v20 }
  0x68   : > { %4522 = vmatpush3.bf16.msra.mxu1 %v5007_v29  ;;  %350 = vst [vmem:[#allocation3 + $0x24] sm:$0xf] %v4325_v53  ;;  %493 = vst [vmem:[#allocation3 + $0xc] sm:$0xf] %v4325_v53  ;;  %v742_v0 = vld [vmem:[#allocation3] sm:$0xff]  ;;  %v408_v3 = vld [vmem:[#allocation2 + $0x32] sm:$0xff]  ;;  %v4327_v7 = vpack.c.bf16 %v312_v2, %v312_v2  ;;  %1581 = vmatprep.mubr.bf16.mxu0 %v5011_v5 }
  0x69   : > { %4523 = vmatprep.subr.bf16.mxu1 %v5010_v32  ;;  %446 = vst [vmem:[#allocation3 + $0x2c] sm:$0xf] %v4341_v54  ;;  %589 = vst [vmem:[#allocation3 + $0x14] sm:$0xf] %v4341_v54  ;;  %v4343_v8 = vpack.c.bf16 %v408_v3, %v408_v3  ;;  %v5030_v28 = vld [vmem:[#allocation7 + $0x128] sm:$0xff]   ;;  %v5034_v30 = vld [vmem:[#allocation7 + $0x160] sm:$0xff]   ;;  %v1876_v32 = vpack.c.bf16 %v5582_v26, %v5575_v15 }
  0x6a   : > { %4484 = vmatpush3.bf16.msra.mxu0 %v5009_v31  ;;  %494 = vst [vmem:[#allocation3 + $0x30] sm:$0xf] %v4349_v59  ;;  %351 = vst [vmem:[#allocation3 + $0x48] sm:$0xf] %v4349_v59  ;;  %v5032_v29 = vld [vmem:[#allocation7 + $0x1e8] sm:$0xff]   ;;  %v4338_v31 = vpack.c.bf16 %v5582_v26, %v5582_v26  ;;  %v5044_v50 = vld [vmem:[#allocation7 + $0x118] sm:$0xff]  }
  0x6b   : > { %4549 = vmatprep.subr.bf16.mxu0 %v5014_v40  ;;  %447 = vst [vmem:[#allocation3 + $0x50] sm:$0xf] %v4342_v61  ;;  %590 = vst [vmem:[#allocation3 + $0x38] sm:$0xf] %v4342_v61  ;;  %v5023_v33 = vld [vmem:[#allocation3 + $0x4c] ss:$36 sps:$4 sm:$0xff]  }
  0x6c   : > { %4524 = vmatpush3.bf16.msra.mxu1 %v5013_v39  ;;  %638 = vst [vmem:[#allocation3 + $0x18] sm:$0xf] %v4349_v59  ;;  %734 = vst [vmem:[#allocation3 + $0x20] sm:$0xf] %v4342_v61  ;;  %v456_v19 = vld [vmem:[#allocation2 + $0x40] sm:$0xff]  ;;  %v290_v51 = vld [vmem:[%s5525_s17 + $0x30] sm:$0xff] }
  0x6d   : > { %4589 = vmatprep.subr.bf16.mxu1 %v5018_v46  ;;  %2287 = vst [vmem:[#allocation3] sm:$0xf] %v5538_v37  ;;  %2335 = vst [vmem:[#allocation3 + $0x4] sm:$0xf] %v5540_v38  ;;  %v4351_v22 = vpack.c.bf16 %v456_v19, %v456_v19  ;;  %v409_v24 = vld [vmem:[#allocation2 + $0x42] sm:$0xff]  ;;  %v5046_v54 = vld [vmem:[#allocation7 + $0x1d8] sm:$0xff]  }
  0x6e   : > { %352 = vst [vmem:[#allocation3 + $0x6c] sm:$0xf] %v4327_v7  ;;  %448 = vst [vmem:[#allocation3 + $0x74] sm:$0xf] %v4343_v8  ;;  %v4344_v27 = vpack.c.bf16 %v409_v24, %v409_v24  ;;  %v5035_v37 = vld [vmem:[#allocation7 + $0x120] sm:$0xff]   ;;  %v314_v38 = vld [vmem:[#allocation2 + $0x50] sm:$0xff] }
  0x6f   : > { %v747_v4 = vld [vmem:[#allocation3 + $0x24] sm:$0xff]  ;;  %495 = vst [vmem:[#allocation3 + $0x54] sm:$0xf] %v4327_v7  ;;  %639 = vst [vmem:[#allocation3 + $0x3c] sm:$0xf] %v4327_v7  ;;  %v410_v39 = vld [vmem:[#allocation2 + $0x52] sm:$0xff]  ;;  %v4329_v41 = vpack.c.bf16 %v314_v38, %v314_v38 }
  0x70   : > { %v4018_v9 = vcombine.low %v742_v0, %v747_v4  ;;  %v743_v10 = vld [vmem:[#allocation3 + $0x8] sm:$0xff]  ;;  %591 = vst [vmem:[#allocation3 + $0x5c] sm:$0xf] %v4343_v8  ;;  %735 = vst [vmem:[#allocation3 + $0x44] sm:$0xf] %v4343_v8  ;;  %v5036_v40 = vld [vmem:[#allocation7 + $0x1e0] sm:$0xff]   ;;  %v4345_v42 = vpack.c.bf16 %v410_v39, %v410_v39 }
  0x71   : > { %v748_v16 = vld [vmem:[#allocation3 + $0x2c] sm:$0xff]  ;;  %2383 = vst [vmem:[#allocation3 + $0x8] sm:$0xf] %v5550_v45  ;;  %689 = vst [vmem:[#allocation3 + $0x88] sm:$0xf] %v4337_v20  ;;  %v5041_v45 = vld [vmem:[#allocation7 + $0x158] sm:$0xff]  }
  0x72   : > { %1582 = vmatmul.mubr.bf16.vlgmr.msra.gmra.mxu0 %v4018_v9  ;;  %v5015_v17 = vld [vmem:[#allocation3 + $0xc] ss:$36 sps:$4 sm:$0xff]   ;;  %v4020_v18 = vcombine.low %v743_v10, %v748_v16  ;;  %545 = vst [vmem:[#allocation3 + $0xa0] sm:$0xf] %v4337_v20  ;;  %496 = vst [vmem:[#allocation3 + $0x78] sm:$0xf] %v4351_v22 }
  0x73   : > { %4550 = vmatpush3.bf16.msra.mxu0 %v5017_v1  ;;  %1646 = vmatprep.mubr.bf16.mxu1 %v5015_v17  ;;  %353 = vst [vmem:[#allocation3 + $0x90] sm:$0xf] %v4351_v22  ;;  %640 = vst [vmem:[#allocation3 + $0x60] sm:$0xf] %v4351_v22  ;;  %v5590_v55 = vmax.f32 %v290_v51, 0.0  ;;  %v5047_v56 = vld [vmem:[#allocation7 + $0x198] sm:$0xff]  }
  0x74   : > { %4551 = vmatprep.subr.bf16.mxu0 %v5020_v6  ;;  %1647 = vmatmul.mubr.bf16.vlgmr.msra.gmra.mxu1 %v4020_v18  ;;  %306 = vst [vmem:[#allocation2 + $0x61] sm:$0xff] %v5582_v26  ;;  %449 = vst [vmem:[#allocation3 + $0x98] sm:$0xf] %v4344_v27  ;;  %v291_v59 = vld [vmem:[%s5525_s17 + $0x38] sm:$0xff]  ;;  %v5049_v62 = vld [vmem:[#allocation7 + $0x110] sm:$0xff]  }
  0x75   : > { %4590 = vmatpush3.bf16.msra.mxu1 %v5019_v11  ;;  %592 = vst [vmem:[#allocation3 + $0x80] sm:$0xf] %v4344_v27  ;;  %736 = vst [vmem:[#allocation3 + $0x68] sm:$0xf] %v4344_v27  ;;  %v5026_v34 = vld [vmem:[#allocation3 + $0x48] ss:$36 sps:$4 sm:$0xff]   ;;  %1589 = vmatprep.mubr.bf16.mxu0 %v5023_v33  ;;  %v4339_v58 = vpack.c.bf16 %v5590_v55, %v5590_v55 }
  0x76   : > { %4591 = vmatprep.subr.bf16.mxu1 %v5022_v14  ;;  %403 = vst [vmem:[#allocation3 + $0xdc] sm:$0xf] %v4338_v31  ;;  %546 = vst [vmem:[#allocation3 + $0xc4] sm:$0xf] %v4338_v31  ;;  %v5031_v47 = vld [vmem:[#allocation3 + $0x50] ss:$36 sps:$4 sm:$0xff]  }
  0x77   : > { %4552 = vmatpush3.bf16.msra.mxu0 %v5021_v13  ;;  %690 = vst [vmem:[#allocation3 + $0xac] sm:$0xf] %v4338_v31  ;;  %354 = vst [vmem:[#allocation3 + $0xb4] sm:$0xf] %v4329_v41  ;;  %v5596_v0 = vmax.f32 %v291_v59, 0.0  ;;  %v5050_v2 = vld [vmem:[#allocation7 + $0x1d0] sm:$0xff]  }
  0x78   : > { %4553 = vmatprep.subr.bf16.mxu0 %v5027_v21  ;;  %450 = vst [vmem:[#allocation3 + $0xbc] sm:$0xf] %v4345_v42  ;;  %497 = vst [vmem:[#allocation3 + $0x9c] sm:$0xf] %v4329_v41  ;;  %v5037_v3 = vld [vmem:[#allocation3 + $0x94] ss:$36 sps:$4 sm:$0xff]  }
  0x79   : > { %4592 = vmatpush3.bf16.msra.mxu1 %v5025_v25  ;;  %v5028_v46 = vld [vmem:[#allocation3 + $0x54] ss:$36 sps:$4 sm:$0xff]   ;;  %641 = vst [vmem:[#allocation3 + $0x84] sm:$0xf] %v4329_v41  ;;  %593 = vst [vmem:[#allocation3 + $0xa4] sm:$0xf] %v4345_v42  ;;  %v4363_v6 = vpack.c.bf16 %v5596_v0, %v5596_v0  ;;  %v1877_v7 = vpack.c.bf16 %v5596_v0, %v5590_v55 }
  0x7a   : > { %1590 = vmatmul.mubr.bf16.gmra.mxu0 %v5026_v34  ;;  %4593 = vmatprep.subr.bf16.mxu1 %v5032_v29  ;;  %737 = vst [vmem:[#allocation3 + $0x8c] sm:$0xf] %v4345_v42  ;;  %307 = vst [vmem:[#allocation2 + $0x71] sm:$0xff] %v5590_v55  ;;  %v5053_v5 = vld [vmem:[#allocation7 + $0x190] sm:$0xff]   ;;  %v5055_v8 = vld [vmem:[#allocation7 + $0x148] sm:$0xff]  }
  0x7b   : > { %4554 = vmatpush3.bf16.msra.mxu0 %v5030_v28  ;;  %v458_v49 = vld [vmem:[#allocation2 + $0x60] sm:$0xff]  ;;  %1654 = vmatprep.mubr.bf16.mxu1 %v5028_v46  ;;  %404 = vst [vmem:[#allocation3 + $0x100] sm:$0xf] %v4339_v58  ;;  %691 = vst [vmem:[#allocation3 + $0xd0] sm:$0xf] %v4339_v58  ;;  %v5058_v9 = vld [vmem:[#allocation7 + $0x108] sm:$0xff]  }
  0x7c   : > { %4555 = vmatprep.subr.bf16.mxu0 %v5034_v30  ;;  %v4353_v53 = vpack.c.bf16 %v458_v49, %v458_v49  ;;  %1655 = vmatmul.mubr.bf16.gmra.mxu1 %v5031_v47  ;;  %v411_v61 = vld [vmem:[#allocation2 + $0x62] sm:$0xff]  ;;  %547 = vst [vmem:[#allocation3 + $0xe8] sm:$0xf] %v4339_v58  ;;  %308 = vst [vmem:[#allocation2 + $0x81] sm:$0xff] %v5596_v0  ;;  %v5069_v25 = vld [vmem:[#allocation7 + $0x238] sm:$0xff]  }
  0x7d   : > { %4594 = vmatpush3.bf16.msra.mxu1 %v5033_v35  ;;  %v4346_v1 = vpack.c.bf16 %v411_v61, %v411_v61  ;;  %1597 = vmatprep.mubr.bf16.mxu0 %v5037_v3  ;;  %v5060_v10 = vld [vmem:[#allocation7 + $0x1c8] sm:$0xff]   ;;  %548 = vst [vmem:[#allocation3 + $0x10c] sm:$0xf] %v4363_v6  ;;  %692 = vst [vmem:[#allocation3 + $0xf4] sm:$0xf] %v4363_v6  ;;  %v5062_v11 = vld [vmem:[#allocation7 + $0x140] sm:$0xff]  }
  0x7e   : > { %4595 = vmatprep.subr.bf16.mxu1 %v5036_v40  ;;  %498 = vst [vmem:[#allocation3 + $0xc0] sm:$0xf] %v4353_v53  ;;  %355 = vst [vmem:[#allocation3 + $0xd8] sm:$0xf] %v4353_v53  ;;  %v5040_v4 = vld [vmem:[#allocation3 + $0x90] ss:$36 sps:$4 sm:$0xff]  }
  0x7f   : > { %4556 = vmatpush3.bf16.msra.mxu0 %v5035_v37  ;;  %642 = vst [vmem:[#allocation3 + $0xa8] sm:$0xf] %v4353_v53  ;;  %451 = vst [vmem:[#allocation3 + $0xe0] sm:$0xf] %v4346_v1  ;;  %v5045_v13 = vld [vmem:[#allocation3 + $0x98] ss:$36 sps:$4 sm:$0xff]  }
  0x80   : > { %4557 = vmatprep.subr.bf16.mxu0 %v5041_v45  ;;  %594 = vst [vmem:[#allocation3 + $0xc8] sm:$0xf] %v4346_v1  ;;  %738 = vst [vmem:[#allocation3 + $0xb0] sm:$0xf] %v4346_v1  ;;  %v5061_v14 = vld [vmem:[#allocation7 + $0x188] sm:$0xff]   ;;  %v5064_v20 = vld [vmem:[#allocation7 + $0x1c0] sm:$0xff]  }
  0x81   : > { %4596 = vmatpush3.bf16.msra.mxu1 %v5039_v43  ;;  %v316_v16 = vld [vmem:[#allocation2 + $0x70] sm:$0xff]  ;;  %v5067_v24 = vld [vmem:[#allocation7 + $0x180] sm:$0xff]   ;;  %v5072_v35 = vld [vmem:[#allocation3 + $0x18] ss:$36 sps:$4 sm:$0xff]  }
  0x82   : > { %4597 = vmatprep.subr.bf16.mxu1 %v5046_v54  ;;  %1598 = vmatmul.mubr.bf16.gmra.mxu0 %v5040_v4  ;;  %v412_v17 = vld [vmem:[#allocation2 + $0x72] sm:$0xff]  ;;  %v4331_v18 = vpack.c.bf16 %v316_v16, %v316_v16  ;;  %v5051_v28 = vld [vmem:[#allocation3 + $0xdc] ss:$36 sps:$4 sm:$0xff]   ;;  %v5078_v39 = vld [vmem:[#allocation3 + $0x64] ss:$36 sps:$4 sm:$0xff]  }
  0x83   : > { %4558 = vmatpush3.bf16.msra.mxu0 %v5044_v50  ;;  %v4347_v19 = vpack.c.bf16 %v412_v17, %v412_v17  ;;  %v460_v21 = vld [vmem:[#allocation2 + $0x80] sm:$0xff]  ;;  %v5065_v27 = vld [vmem:[#allocation3 + $0x14] ss:$36 sps:$4 sm:$0xff]   ;;  %1605 = vmatprep.mubr.bf16.mxu0 %v5051_v28  ;;  %v5077_v47 = vld [vmem:[#allocation7 + $0x228] sm:$0xff]  }
  0x84   : > { %4559 = vmatprep.subr.bf16.mxu0 %v5048_v57  ;;  %356 = vst [vmem:[#allocation3 + $0xfc] sm:$0xf] %v4331_v18  ;;  %v4355_v22 = vpack.c.bf16 %v460_v21, %v460_v21  ;;  %499 = vst [vmem:[#allocation3 + $0xe4] sm:$0xf] %v4331_v18  ;;  %v5070_v30 = vld [vmem:[#allocation3 + $0x1c] ss:$36 sps:$4 sm:$0xff]  }
  0x85   : > { %4598 = vmatpush3.bf16.msra.mxu1 %v5047_v56  ;;  %v5042_v12 = vld [vmem:[#allocation3 + $0x9c] ss:$36 sps:$4 sm:$0xff]   ;;  %452 = vst [vmem:[#allocation3 + $0x104] sm:$0xf] %v4347_v19  ;;  %643 = vst [vmem:[#allocation3 + $0xcc] sm:$0xf] %v4331_v18 }
  0x86   : > { %4599 = vmatprep.subr.bf16.mxu1 %v5050_v2  ;;  %1662 = vmatprep.mubr.bf16.mxu1 %v5042_v12  ;;  %595 = vst [vmem:[#allocation3 + $0xec] sm:$0xf] %v4347_v19  ;;  %739 = vst [vmem:[#allocation3 + $0xd4] sm:$0xf] %v4347_v19  ;;  %v5068_v34 = vld [vmem:[#allocation3 + $0x10] ss:$36 sps:$4 sm:$0xff]  }
  0x87   : > { %4560 = vmatpush3.bf16.msra.mxu0 %v5049_v62  ;;  %1663 = vmatmul.mubr.bf16.gmra.mxu1 %v5045_v13  ;;  %500 = vst [vmem:[#allocation3 + $0x108] sm:$0xf] %v4355_v22  ;;  %644 = vst [vmem:[#allocation3 + $0xf0] sm:$0xf] %v4355_v22  ;;  %v5073_v37 = vld [vmem:[#allocation7 + $0x230] sm:$0xff]   ;;  %v5090_v40 = vld [vmem:[%s6027_s3 + $0x38] sm:$0xff]  }
  0x88   : > { %4561 = vmatprep.subr.bf16.mxu0 %v5055_v8  ;;  %v5074_v38 = vld [vmem:[#allocation3 + $0x5c] ss:$36 sps:$4 sm:$0xff]   ;;  %v605_v43 = vld [vmem:[#allocation2 + $0x90] sm:$0xff]  ;;  %v5082_v56 = vld [vmem:[#allocation3 + $0xa4] ss:$36 sps:$4 sm:$0xff]  }
  0x89   : > { %4600 = vmatpush3.bf16.msra.mxu1 %v5053_v5  ;;  %v556_v41 = vld [vmem:[#allocation2 + $0x82] sm:$0xff]  ;;  %v653_v45 = vld [vmem:[#allocation2 + $0x91] sm:$0xff]  ;;  %v4379_v49 = vpack.c.bf16 %v605_v43, %v605_v43 }
  0x8a   : > { %4601 = vmatprep.subr.bf16.mxu1 %v5060_v10  ;;  %v4371_v42 = vpack.c.bf16 %v556_v41, %v556_v41  ;;  %v5076_v46 = vld [vmem:[#allocation3 + $0x58] ss:$36 sps:$4 sm:$0xff]   ;;  %v4387_v50 = vpack.c.bf16 %v653_v45, %v653_v45  ;;  %v5097_v51 = vld [vmem:[%s6027_s3 + $0x30] sm:$0xff]   ;;  %v5080_v53 = vld [vmem:[#allocation3 + $0x60] ss:$36 sps:$4 sm:$0xff]  }
  0x8b   : > { %4562 = vmatpush3.bf16.msra.mxu0 %v5058_v9  ;;  %v5054_v29 = vld [vmem:[#allocation3 + $0xd8] ss:$36 sps:$4 sm:$0xff]   ;;  %v5081_v54 = vld [vmem:[#allocation7 + $0x220] sm:$0xff]   ;;  %645 = vst [vmem:[#allocation3 + $0x114] sm:$0xf] %v4379_v49  ;;  %v5099_v58 = vld [vmem:[%s6027_s3 + $0x28] sm:$0xff]  }
  0x8c   : > { %4563 = vmatprep.subr.bf16.mxu0 %v5062_v11  ;;  %v5059_v33 = vld [vmem:[#allocation3 + $0xe0] ss:$36 sps:$4 sm:$0xff]   ;;  %1606 = vmatmul.mubr.bf16.gmra.mxu0 %v5054_v29  ;;  %596 = vst [vmem:[#allocation3 + $0x110] sm:$0xf] %v4371_v42  ;;  %740 = vst [vmem:[#allocation3 + $0xf8] sm:$0xf] %v4371_v42 }
  0x8d   : > { %4602 = vmatpush3.bf16.msra.mxu1 %v5061_v14  ;;  %1711 = vmatprep.mubr.bf16.mxu0 %v5065_v27  ;;  %693 = vst [vmem:[#allocation3 + $0x118] sm:$0xf] %v4387_v50  ;;  %v5086_v57 = vld [vmem:[#allocation3 + $0xac] ss:$36 sps:$4 sm:$0xff]   ;;  %v5102_v59 = vld [vmem:[%s6027_s3 + $0x20] sm:$0xff]   ;;  %v5085_v61 = vld [vmem:[#allocation7 + $0x218] sm:$0xff]  }
  0x8e   : > { %4603 = vmatprep.subr.bf16.mxu1 %v5064_v20  ;;  %v5056_v31 = vld [vmem:[#allocation3 + $0xe4] ss:$36 sps:$4 sm:$0xff]   ;;  %2582 = vst [vmem:[#allocation3 + $0x114] sm:$0xf] %v4379_v49  ;;  %v701_v3 = vld [vmem:[#allocation2 + $0x92] sm:$0xff] }
  0x8f   : > { %4564 = vmatpush3.bf16.msra.mxu0 %v5063_v23  ;;  %1670 = vmatprep.mubr.bf16.mxu1 %v5056_v31  ;;  %v5084_v62 = vld [vmem:[#allocation3 + $0xa0] ss:$36 sps:$4 sm:$0xff]   ;;  %v5088_v2 = vld [vmem:[#allocation3 + $0xa8] ss:$36 sps:$4 sm:$0xff]   ;;  %v4395_v5 = vpack.c.bf16 %v701_v3, %v701_v3  ;;  %v5089_v6 = vld [vmem:[#allocation7 + $0x210] sm:$0xff]  }
  0x90   : > { %4825 = vmatprep.subr.bf16.mxu0 %v5069_v25  ;;  %1671 = vmatmul.mubr.bf16.gmra.mxu1 %v5059_v33  ;;  %v5103_v8 = vld [vmem:[%s6027_s3 + $0x18] sm:$0xff]   ;;  %v5094_v9 = vld [vmem:[#allocation7 + $0x208] sm:$0xff]   ;;  %v775_v10 = vld [vmem:[#allocation3 + $0xf0] sm:$0xff] }
  0x91   : > { %4604 = vmatpush3.bf16.msra.mxu1 %v5067_v24  ;;  %1776 = vmatprep.mubr.bf16.mxu1 %v5070_v30  ;;  %741 = vst [vmem:[#allocation3 + $0x11c] sm:$0xf] %v4395_v5  ;;  %v5106_v12 = vld [vmem:[%s6027_s3 + $0x10] sm:$0xff]   ;;  %v2167_v14 = vld [vmem:[%s6025_s1] sm:$0xff]  ;;  %v5093_v17 = vld [vmem:[#allocation3 + $0xe8] ss:$36 sps:$4 sm:$0xff]  }
  0x92   : > { %4849 = vmatprep.subr.bf16.mxu1 %v5090_v40  ;;  %v2169_v13 = vld [vmem:[%s6025_s1 + $0x10] sm:$0xff]  ;;  %v5100_v16 = vld [vmem:[#allocation3 + $0x20] ss:$36 sps:$4 sm:$0xff]   ;;  %v5107_v19 = vld [vmem:[%s6027_s3 + $0x8] sm:$0xff]   ;;  %2177 = vperm.xlu0 %4978, %v2167_v14  }
  0x93   : > { %v5091_v4 = vld [vmem:[#allocation3 + $0xec] ss:$36 sps:$4 sm:$0xff]   ;;  %v5098_v18 = vld [vmem:[#allocation7 + $0x200] sm:$0xff]   ;;  %2187 = vperm.xlu1 %4979, %v2169_v13   ;;  %v2170_v23 = vld [vmem:[%s6025_s1 + $0x18] sm:$0xff] }
  0x94   : > { %1712 = vmatmul.mubr.bf16.vlgmr.msra.gmra.mxu0 %v5068_v34  ;;  %v5095_v1 = vld [vmem:[#allocation3 + $0xf4] ss:$36 sps:$4 sm:$0xff]   ;;  %v5108_v22 = vld [vmem:[%s6027_s3] sm:$0xff]   ;;  %v2168_v24 = vld [vmem:[%s6025_s1 + $0x8] sm:$0xff] }
  0x95   : > { %4826 = vmatpush3.bf16.msra.mxu0 %v5069_v25  ;;  %1719 = vmatprep.mubr.bf16.mxu0 %v5074_v38  ;;  %2630 = vst [vmem:[#allocation3 + $0x118] sm:$0xf] %v4387_v50  ;;  %v5101_v25 = vld [vmem:[#allocation3 + $0x68] ss:$36 sps:$4 sm:$0xff]   ;;  %v5104_v27 = vld [vmem:[#allocation3 + $0xb0] ss:$36 sps:$4 sm:$0xff]  }
  0x96   : > { %4827 = vmatprep.subr.bf16.mxu0 %v5073_v37  ;;  %v2172_v28 = vld [vmem:[%s6025_s1 + $0x28] sm:$0xff]  ;;  %v2171_v29 = vld [vmem:[%s6025_s1 + $0x20] sm:$0xff]  ;;  %2182 = vperm.xlu0 %4978, %v2168_v24   ;;  %v2174_v36 = vld [vmem:[%s6025_s1 + $0x38] sm:$0xff] }
  0x97   : > { %2192 = vperm.xlu1 %4979, %v2170_v23   ;;  %v2173_v44 = vld [vmem:[%s6025_s1 + $0x30] sm:$0xff]  ;;  %v5110_v30 = vld [vmem:[#allocation7 + $0x278] sm:$0xff]   ;;  %v5115_v60 = vld [vmem:[#allocation7 + $0x2a8] sm:$0xff]  }
  0x98   : > { %1777 = vmatmul.mubr.bf16.vlgmr.msra.gmra.mxu1 %v5072_v35  ;;  %v5105_v21 = vld [vmem:[#allocation3 + $0xf8] ss:$36 sps:$4 sm:$0xff]   ;;  %v5111_v31 = vld [vmem:[#allocation7 + $0x2b0] sm:$0xff]   ;;  %v5117_v15 = vld [vmem:[#allocation7 + $0x268] sm:$0xff]  }
  0x99   : > { %1784 = vmatprep.mubr.bf16.mxu1 %v5078_v39  ;;  %4850 = vmatpush3.bf16.msra.mxu1 %v5090_v40  ;;  %2678 = vst [vmem:[#allocation3 + $0x11c] sm:$0xf] %v4395_v5  ;;  %v5112_v33 = vld [vmem:[#allocation7 + $0x338] sm:$0xff]   ;;  %v5113_v34 = vld [vmem:[#allocation7 + $0x270] sm:$0xff]   ;;  %v5120_v55 = vld [vmem:[#allocation7 + $0x328] sm:$0xff]  }
  0x9a   : > { %4828 = vmatpush3.bf16.msra.mxu0 %v5073_v37  ;;  %4851 = vmatprep.subr.bf16.mxu1 %v5097_v51  ;;  %v5114_v52 = vld [vmem:[#allocation7 + $0x2f8] sm:$0xff]   ;;  %v5118_v26 = vld [vmem:[#allocation7 + $0x2f0] sm:$0xff]   ;;  %v5121_v0 = vld [vmem:[#allocation7 + $0x260] sm:$0xff]  }
  0x9b   : > { %4829 = vmatprep.subr.bf16.mxu0 %v5077_v47  ;;  %2202 = vperm.xlu1 %4979, %v2172_v28   ;;  %v5123_v35 = vld [vmem:[#allocation7 + $0x298] sm:$0xff]   ;;  %v5124_v37 = vld [vmem:[#allocation7 + $0x320] sm:$0xff]   ;;  %v5127_v40 = vld [vmem:[#allocation7 + $0x290] sm:$0xff]  }
  0x9c   : > { %1720 = vmatmul.mubr.bf16.gmra.mxu0 %v5076_v46  ;;  %v780_v11 = vld [vmem:[#allocation3 + $0x114] sm:$0xff]  ;;  %2197 = vperm.xlu0 %4978, %v2171_v29   ;;  %v5126_v39 = vld [vmem:[#allocation7 + $0x2e0] sm:$0xff]   ;;  %v5131_v45 = vld [vmem:[#allocation7 + $0x288] sm:$0xff]  }
  0x9d   : > { %4852 = vmatpush3.bf16.msra.mxu1 %v5097_v51  ;;  %1727 = vmatprep.mubr.bf16.mxu0 %v5082_v56  ;;  %v4051_v20 = vcombine.low %v775_v10, %v780_v11  ;;  %v5125_v38 = vld [vmem:[#allocation7 + $0x258] sm:$0xff]   ;;  %v5129_v42 = vld [vmem:[#allocation7 + $0x250] sm:$0xff]   ;;  %v5135_v50 = vld [vmem:[#allocation7 + $0x280] sm:$0xff]  }
  0x9e   : > { %4830 = vmatpush3.bf16.msra.mxu0 %v5077_v47  ;;  %4853 = vmatprep.subr.bf16.mxu1 %v5099_v58  ;;  %v5128_v41 = vld [vmem:[#allocation7 + $0x318] sm:$0xff]   ;;  %v5132_v46 = vld [vmem:[#allocation7 + $0x310] sm:$0xff]   ;;  %v5133_v47 = vld [vmem:[#allocation7 + $0x248] sm:$0xff]  }
  0x9f   : > { %4831 = vmatprep.subr.bf16.mxu0 %v5081_v54  ;;  %2212 = vperm.xlu1 %4979, %v2174_v36   ;;  %v5130_v43 = vld [vmem:[#allocation7 + $0x2d8] sm:$0xff]   ;;  %v5134_v49 = vld [vmem:[#allocation7 + $0x2d0] sm:$0xff]   ;;  %v5136_v51 = vld [vmem:[#allocation7 + $0x308] sm:$0xff]  }
  0xa0   : > { %1785 = vmatmul.mubr.bf16.gmra.mxu1 %v5080_v53  ;;  %2207 = vperm.xlu0 %4978, %v2173_v44   ;;  %v5137_v53 = vld [vmem:[#allocation7 + $0x240] sm:$0xff]  }
  0xa1   : > { %1792 = vmatprep.mubr.bf16.mxu1 %v5086_v57  ;;  %4854 = vmatpush3.bf16.msra.mxu1 %v5099_v58  ;;  %v5142_v56 = vld [vmem:[#allocation7 + $0x300] sm:$0xff]   ;;  %v5143_v57 = vld [vmem:[#allocation7 + $0x3b8] sm:$0xff]  }
  0xa2   : > { %4832 = vmatpush3.bf16.msra.mxu0 %v5081_v54  ;;  %4855 = vmatprep.subr.bf16.mxu1 %v5102_v59  ;;  %v5138_v54 = vld [vmem:[#allocation7 + $0x2c8] sm:$0xff]   ;;  %v5144_v58 = vld [vmem:[#allocation7 + $0x2c0] sm:$0xff]  }
  0xa3   : > { %4833 = vmatprep.subr.bf16.mxu0 %v5085_v61 }
  0xa4   : > { %1728 = vmatmul.mubr.bf16.gmra.mxu0 %v5084_v62 }
  0xa5   : > { %4856 = vmatpush3.bf16.msra.mxu1 %v5102_v59  ;;  %1735 = vmatprep.mubr.bf16.mxu0 %v5091_v4  ;;  %v5152_v59 = vld [vmem:[#allocation7 + $0x438] sm:$0xff]  }
  0xa6   : > { %4834 = vmatpush3.bf16.msra.mxu0 %v5085_v61  ;;  %4857 = vmatprep.subr.bf16.mxu1 %v5103_v8 }
  0xa7   : > { %4835 = vmatprep.subr.bf16.mxu0 %v5089_v6 }
  0xa8   : > { %1793 = vmatmul.mubr.bf16.gmra.mxu1 %v5088_v2 }
  0xa9   : > { %1800 = vmatprep.mubr.bf16.mxu1 %v5095_v1  ;;  %4858 = vmatpush3.bf16.msra.mxu1 %v5103_v8 }
  0xaa   : > { %4836 = vmatpush3.bf16.msra.mxu0 %v5089_v6  ;;  %4859 = vmatprep.subr.bf16.mxu1 %v5106_v12 }
  0xab   : > { %4837 = vmatprep.subr.bf16.mxu0 %v5094_v9 }
  0xac   : > { %1736 = vmatmul.mubr.bf16.gmra.mxu0 %v5093_v17 }
  0xad   : > { %4860 = vmatpush3.bf16.msra.mxu1 %v5106_v12  ;;  %4841 = vmatprep.mubr.bf16.mxu0 %v5100_v16 }
  0xae   : > { %4838 = vmatpush3.bf16.msra.mxu0 %v5094_v9  ;;  %4861 = vmatprep.subr.bf16.mxu1 %v5107_v19 }
  0xaf   : > { %4839 = vmatprep.subr.bf16.mxu0 %v5098_v18 }
  0xb0   : > { %1801 = vmatmul.mubr.bf16.gmra.mxu1 %v4051_v20 }
  0xb1   : > { %4865 = vmatprep.mubr.bf16.mxu1 %v1874_v48  ;;  %4862 = vmatpush3.bf16.msra.mxu1 %v5107_v19  ;;  %v5109_v48 = vld [vmem:[#allocation7 + $0x2b8] sm:$0xff]  }
  0xb2   : > { %4840 = vmatpush3.bf16.msra.mxu0 %v5098_v18  ;;  %4863 = vmatprep.subr.bf16.mxu1 %v5108_v22 }
  0xb3   : > { %4653 = vmatprep.subr.bf16.mxu0 %v5109_v48 }
  0xb5   : > { %4842 = vmatmul.mubr.bf16.vlgmr.msra.gmra.mxu0 %v5101_v25  ;;  %4864 = vmatpush3.bf16.msra.mxu1 %v5108_v22 }
  0xb6   : > { %4845 = vmatprep.mubr.bf16.mxu0 %v5104_v27  ;;  %4654 = vmatpush3.bf16.msra.mxu0 %v5110_v30 }
  0xb7   : > { %4655 = vmatprep.subr.bf16.mxu0 %v5111_v31  ;;  %4693 = vmatprep.subr.bf16.mxu1 %v5112_v33 }
  0xb8   : > { %4866 = vmatmul.mubr.bf16.vlgmr.msra.gmra.mxu1 %v1875_v63  ;;  %v5116_v63 = vld [vmem:[#allocation7 + $0x330] sm:$0xff]  }
  0xb9   : > { %4869 = vmatprep.mubr.bf16.mxu1 %v1876_v32  ;;  %4694 = vmatpush3.bf16.msra.mxu1 %v5114_v52  ;;  %v5119_v32 = vld [vmem:[#allocation7 + $0x2a0] sm:$0xff]  }
  0xba   : > { %4656 = vmatpush3.bf16.msra.mxu0 %v5113_v34  ;;  %4695 = vmatprep.subr.bf16.mxu1 %v5116_v63 }
  0xbb   : > { %4657 = vmatprep.subr.bf16.mxu0 %v5115_v60 }
  0xbd   : > { %4846 = vmatmul.mubr.bf16.gmra.mxu0 %v5105_v21  ;;  %4696 = vmatpush3.bf16.msra.mxu1 %v5118_v26 }
  0xbe   : > { %4658 = vmatpush3.bf16.msra.mxu0 %v5117_v15  ;;  %4697 = vmatprep.subr.bf16.mxu1 %v5120_v55 }
  0xbf   : > { %4659 = vmatprep.subr.bf16.mxu0 %v5119_v32 }
  0xc0   : > { %4870 = vmatmul.mubr.bf16.gmra.mxu1 %v1877_v7  ;;  %v5122_v7 = vld [vmem:[#allocation7 + $0x2e8] sm:$0xff]  }
  0xc1   : > { %4698 = vmatpush3.bf16.msra.mxu1 %v5122_v7 }
  0xc2   : > { %4660 = vmatpush3.bf16.msra.mxu0 %v5121_v0  ;;  %4699 = vmatprep.subr.bf16.mxu1 %v5124_v37 }
  0xc3   : > { %4661 = vmatprep.subr.bf16.mxu0 %v5123_v35 }
  0xc5   : > { %4700 = vmatpush3.bf16.msra.mxu1 %v5126_v39 }
  0xc6   : > { %4662 = vmatpush3.bf16.msra.mxu0 %v5125_v38  ;;  %4701 = vmatprep.subr.bf16.mxu1 %v5128_v41 }
  0xc7   : > { %4663 = vmatprep.subr.bf16.mxu0 %v5127_v40 }
  0xc9   : > { %4702 = vmatpush3.bf16.msra.mxu1 %v5130_v43 }
  0xca   : > { %4664 = vmatpush3.bf16.msra.mxu0 %v5129_v42  ;;  %4703 = vmatprep.subr.bf16.mxu1 %v5132_v46  ;;  %v4017_v46 = vld [vmem:[%s6028_s4] ss:$0 sm:$0xff] }
  0xcb   : > { %4665 = vmatprep.subr.bf16.mxu0 %v5131_v45 }
  0xcd   : > { %4704 = vmatpush3.bf16.msra.mxu1 %v5134_v49 }
  0xce   : > { %4666 = vmatpush3.bf16.msra.mxu0 %v5133_v47  ;;  %4705 = vmatprep.subr.bf16.mxu1 %v5136_v51 }
  0xcf   : > { %4667 = vmatprep.subr.bf16.mxu0 %v5135_v50 }
  0xd1   : > { %4706 = vmatpush3.bf16.msra.mxu1 %v5138_v54 }
  0xd2   : > { %4668 = vmatpush3.bf16.msra.mxu0 %v5137_v53  ;;  %4707 = vmatprep.subr.bf16.mxu1 %v5142_v56 }
  0xd3   : > { %4733 = vmatprep.subr.bf16.mxu0 %v5143_v57 }
  0xd5   : > { %4708 = vmatpush3.bf16.msra.mxu1 %v5144_v58 }
  0xd6   : > { %4773 = vmatprep.subr.bf16.mxu1 %v5152_v59 }
 0x132   : > { %v4485_v61 = vpop.f32.mrf.mxu0 }
 0x134   : > { %v4486_v62 = vpop.f32.mrf.mxu0  ;;  %v4525_v1 = vpop.f32.mrf.mxu1 }
 0x135   : > { %v4487_v45 = vadd.f32 %v4486_v62, %v4485_v61 }
 0x136   : > { %v4488_v2 = vpop.f32.mrf.mxu0  ;;  %v4526_v3 = vpop.f32.mrf.mxu1 }
 0x137   : > { %v1584_v58 = vadd.f32 %v4487_v45, %v4017_v46  ;;  %v4527_v59 = vadd.f32 %v4526_v3, %v4525_v1 }
 0x138   : > { %v4489_v4 = vpop.f32.mrf.mxu0  ;;  %v5663_v5 = vpop.f32.mrf.mxu1 }
 0x139   : > { %v4490_v54 = vadd.f32 %v4489_v4, %v4488_v2 }
 0x13a   : > { %v4491_v6 = vpop.f32.mrf.mxu0  ;;  %v5665_v8 = vpop.f32.mrf.mxu1 }
 0x13b   : > { %v4530_v2 = vadd.f32 %v5665_v8, %v5663_v5 }
 0x13c   : > { %v4492_v9 = vpop.f32.mrf.mxu0  ;;  %v4531_v11 = vpop.f32.mrf.mxu1 }
 0x13d   : > { %v4493_v41 = vadd.f32 %v4492_v9, %v4491_v6 }
 0x13e   : > { %v4494_v10 = vpop.f32.mrf.mxu0  ;;  %v4532_v12 = vpop.f32.mrf.mxu1 }
 0x13f   : > { %v1592_v51 = vadd.f32 %v4493_v41, %v4017_v46  ;;  %v4533_v53 = vadd.f32 %v4532_v12, %v4531_v11  ;;  %v1649_v41 = vadd.f32 %v4527_v59, %v1584_v58 }
 0x140   : > { %v4495_v13 = vpop.f32.mrf.mxu0  ;;  %v4534_v14 = vpop.f32.mrf.mxu1 }
 0x141   : > { %v4496_v47 = vadd.f32 %v4495_v13, %v4494_v10  ;;  %v1657_v10 = vadd.f32 %v4533_v53, %v1592_v51 }
 0x142   : > { %v4497_v16 = vpop.f32.mrf.mxu0  ;;  %v4535_v17 = vpop.f32.mrf.mxu1 }
 0x143   : > { %v1595_v61 = vadd.f32 %v4496_v47, %v4017_v46  ;;  %v4536_v62 = vadd.f32 %v4535_v17, %v4534_v14 }
 0x144   : > { %v4498_v18 = vpop.f32.mrf.mxu0 }
 0x145   : > { %v4499_v9 = vadd.f32 %v4498_v18, %v4497_v16 }
 0x146   : > { %v5671_v21 = vpop.f32.mrf.mxu0 }
 0x147   : > { %v5667_v19 = vpop.f32.mrf.mxu1  ;;  %v1600_v14 = vadd.f32 %v4499_v9, %v4017_v46 }
 0x148   : > { %v5675_v23 = vpop.f32.mrf.mxu0 }
 0x149   : > { %v5669_v20 = vpop.f32.mrf.mxu1 }
 0x14a   : > { %v4539_v16 = vadd.f32 %v5669_v20, %v5667_v19 }
 0x14b   : > { %v5673_v22 = vpop.f32.mrf.mxu1 }
 0x14c   : > { %v4503_v25 = vpop.f32.mrf.mxu0 }
 0x14d   : > { %v5677_v24 = vpop.f32.mrf.mxu1 }
 0x14e   : > { %6045 = vst [vmem:[#allocation13_spill] sm:$0xff] %v5677_v24  ;;  %v4504_v27 = vpop.f32.mrf.mxu0 }
 0x14f   : > { %v4505_v13 = vadd.f32 %v4504_v27, %v4503_v25  ;;  %v2023_v27 = vld [vmem:[#allocation2] sm:$0xff] }
 0x150   : > { %v5679_v28 = vpop.f32.mrf.mxu1  ;;  %v4506_v29 = vpop.f32.mrf.mxu0 }
 0x152   : > { %v5681_v36 = vpop.f32.mrf.mxu1  ;;  %v4507_v44 = vpop.f32.mrf.mxu0 }
 0x153   : > { %v4508_v45 = vadd.f32 %v4507_v44, %v4506_v29  ;;  %v4545_v5 = vadd.f32 %v5681_v36, %v5679_v28  ;;  %v4502_v29 = vadd.f32 %v5675_v23, %v5671_v21 }
 0x154   : > { %v5683_v48 = vpop.f32.mrf.mxu1  ;;  %v4565_v31 = vpop.f32.mrf.mxu0 }
 0x155   : > { %v1611_v19 = vadd.f32 %v4508_v45, %v4017_v46 }
 0x156   : > { %v5685_v30 = vpop.f32.mrf.mxu1  ;;  %v4566_v33 = vpop.f32.mrf.mxu0 }
 0x157   : > { %v4548_v47 = vadd.f32 %v5685_v30, %v5683_v48 }
 0x158   : > { %v4605_v34 = vpop.f32.mrf.mxu1  ;;  %v4568_v52 = vpop.f32.mrf.mxu0 }
 0x15a   : > { %v4606_v60 = vpop.f32.mrf.mxu1  ;;  %v4569_v63 = vpop.f32.mrf.mxu0 }
 0x15b   : > { %v4570_v17 = vadd.f32 %v4569_v63, %v4568_v52 }
 0x15c   : > { %v5687_v15 = vpop.f32.mrf.mxu1  ;;  %v4571_v26 = vpop.f32.mrf.mxu0 }
 0x15e   : > { %v5689_v32 = vpop.f32.mrf.mxu1  ;;  %v4572_v55 = vpop.f32.mrf.mxu0 }
 0x15f   : > { %v4573_v6 = vadd.f32 %v4572_v55, %v4571_v26  ;;  %v1660_v26 = vadd.f32 %v4536_v62, %v1595_v61  ;;  %v4607_v55 = vadd.f32 %v4606_v60, %v4605_v34  ;;  %v4610_v28 = vadd.f32 %v5689_v32, %v5687_v15 }
 0x160   : > { %v4611_v0 = vpop.f32.mrf.mxu1  ;;  %v4574_v7 = vpop.f32.mrf.mxu0  ;;  %v1665_v60 = vadd.f32 %v4539_v16, %v1600_v14 }
 0x161   : > { %v1722_v1 = vadd.f32 %v4573_v6, %v1657_v10 }
 0x162   : > { %v4612_v35 = vpop.f32.mrf.mxu1  ;;  %v4575_v37 = vpop.f32.mrf.mxu0 }
 0x163   : > { %v4576_v4 = vadd.f32 %v4575_v37, %v4574_v7  ;;  %v4613_v3 = vadd.f32 %v4612_v35, %v4611_v0 }
 0x164   : > { %v4614_v38 = vpop.f32.mrf.mxu1  ;;  %v4577_v39 = vpop.f32.mrf.mxu0 }
 0x165   : > { %v1725_v44 = vadd.f32 %v4576_v4, %v1660_v26  ;;  %v1787_v52 = vadd.f32 %v4613_v3, %v1722_v1  ;;  %v2055_v4 = vld [vmem:[#allocation2 + $0x2] sm:$0xff] }
 0x166   : > { %v4615_v40 = vpop.f32.mrf.mxu1  ;;  %v4578_v42 = vpop.f32.mrf.mxu0 }
 0x167   : > { %v4616_v0 = vadd.f32 %v4615_v40, %v4614_v38  ;;  %v4579_v36 = vadd.f32 %v4578_v42, %v4577_v39  ;;  %v1603_v40 = vadd.f32 %v4502_v29, %v4017_v46  ;;  %v1676_v39 = vadd.f32 %v4548_v47, %v1611_v19 }
 0x168   : > { %v5691_v43 = vpop.f32.mrf.mxu1  ;;  %v5696_v49 = vpop.f32.mrf.mxu0 }
 0x169   : > { %6046 = vst [vmem:[#allocation14_spill] sm:$0xff] %v5691_v43  ;;  %6047 = vst [vmem:[#allocation15_spill] sm:$0xff] %v5696_v49  ;;  %v4567_v49 = vadd.f32 %v4566_v33, %v4565_v31  ;;  %v2039_v31 = vld [vmem:[#allocation2 + $0x1] sm:$0xff]  ;;  %v1608_v33 = vadd.f32 %v4505_v13, %v4017_v46  ;;  %v1790_v58 = vadd.f32 %v4616_v0, %v1725_v44 }
 0x16a   : > { %v5698_v50 = vpop.f32.mrf.mxu1  ;;  %v5700_v56 = vpop.f32.mrf.mxu0  ;;  %v2047_v63 = vadd.f32 %v2039_v31, %v2023_v27  ;;  %v1730_v42 = vadd.f32 %v4579_v36, %v1665_v60 }
 0x16b   : > { %6048 = vst [vmem:[#allocation16_spill] sm:$0xff] %v5698_v50  ;;  %v1587_v50 = vadd.f32 %v4490_v54, %v4017_v46  ;;  %v1714_v8 = vadd.f32 %v4567_v49, %v1649_v41  ;;  %v1673_v49 = vadd.f32 %v4545_v5, %v1608_v33 }
 0x16c   : > { %v5702_v57 = vpop.f32.mrf.mxu1  ;;  %v4583_v43 = vpop.f32.mrf.mxu0  ;;  %v2063_v31 = vadd.f32 %v2055_v4, %v2047_v63 }
 0x16d   : > { %v1652_v7 = vadd.f32 %v4530_v2, %v1587_v50  ;;  %v1779_v38 = vadd.f32 %v4607_v55, %v1714_v8  ;;  %v5751_v55 = vld [vmem:[%s6028_s4 + $0x1] ss:$0 sm:$0xff] }
 0x16e   : > { %v5704_v24 = vpop.f32.mrf.mxu1  ;;  %v4584_v11 = vpop.f32.mrf.mxu0 }
 0x16f   : > { %v4585_v20 = vadd.f32 %v4584_v11, %v4583_v43  ;;  %v1717_v51 = vadd.f32 %v4570_v17, %v1652_v7  ;;  %v6049_v43 = vld [vmem:[#allocation13_spill] sm:$0xff] }
 0x170   : > { %v4623_v12 = vpop.f32.mrf.mxu1  ;;  %v4586_v18 = vpop.f32.mrf.mxu0  ;;  %v4542_v50 = vadd.f32 %v6049_v43, %v5673_v22  ;;  %v6050_v6 = vld [vmem:[#allocation15_spill] sm:$0xff]  ;;  %v6051_v22 = vld [vmem:[#allocation14_spill] sm:$0xff] }
 0x171   : > { %v1738_v48 = vadd.f32 %v4585_v20, %v1673_v49  ;;  %v4582_v46 = vadd.f32 %v5700_v56, %v6050_v6  ;;  %v1782_v62 = vadd.f32 %v4610_v28, %v1717_v51 }
 0x172   : > { %v4624_v25 = vpop.f32.mrf.mxu1  ;;  %v4587_v35 = vpop.f32.mrf.mxu0  ;;  %v6052_v9 = vld [vmem:[#allocation16_spill] sm:$0xff]  ;;  %v1668_v41 = vadd.f32 %v4542_v50, %v1603_v40 }
 0x173   : > { %v4588_v53 = vadd.f32 %v4587_v35, %v4586_v18  ;;  %v4625_v30 = vadd.f32 %v4624_v25, %v4623_v12  ;;  %v4619_v10 = vadd.f32 %v6052_v9, %v6051_v22  ;;  %v4622_v25 = vadd.f32 %v5704_v24, %v5702_v57 }
 0x174   : > { %v4626_v37 = vpop.f32.mrf.mxu1  ;;  %v1733_v18 = vadd.f32 %v4582_v46, %v1668_v41 }
 0x175   : > { %v4843_v34 = vpop.f32.mrf.mxu0  ;;  %v1741_v45 = vadd.f32 %v4588_v53, %v1676_v39  ;;  %v1803_v14 = vadd.f32 %v4625_v30, %v1738_v48  ;;  %v1795_v8 = vadd.f32 %v4619_v10, %v1730_v42  ;;  %v5803_v39 = vpop.permute.xlu1 %2187 }
 0x176   : > { %v4627_v21 = vpop.f32.mrf.mxu1  ;;  %v5718_v23 = vadd.f32 %v4843_v34, %v1787_v52  ;;  %v1798_v47 = vadd.f32 %v4622_v25, %v1733_v18  ;;  %v2178_v18 = vpop.permute.xlu0 %2177 }
 0x177   : > { %v1843_v54 = vpop.f32.mrf.mxu0  ;;  %v4628_v1 = vadd.f32 %v4627_v21, %v4626_v37 }
 0x178   : > { %v2233_v59 = vmax.f32 %v5718_v23, 0.0  ;;  %2017 = vst [vmem:[#allocation2 + $0x31] sm:$0xff] %v5718_v23  ;;  %v5724_v15 = vadd.f32 %v1843_v54, %v1779_v38  ;;  %v4867_v32 = vpop.f32.mrf.mxu1 }
 0x179   : > { %v4844_v61 = vpop.f32.mrf.mxu0  ;;  %v1806_v29 = vadd.f32 %v4628_v1, %v1741_v45  ;;  %v5772_v51 = vadd.f32 %v4867_v32, %v5751_v55 }
 0x17a   : > { %2015 = vst [vmem:[#allocation2 + $0x11] sm:$0xff] %v5724_v15  ;;  %v2231_v13 = vmax.f32 %v5724_v15, 0.0  ;;  %v5732_v2 = vadd.f32 %v4844_v61, %v1790_v58  ;;  %v1984_v11 = vpop.f32.mrf.mxu1  ;;  %v4407_v12 = vpack.c.bf16 %v2233_v59, %v2233_v59 }
 0x17b   : > { %v1846_v3 = vpop.f32.mrf.mxu0  ;;  %v5775_v34 = vadd.f32 %v5751_v55, %v1984_v11 }
 0x17c   : > { %v5735_v56 = vmax.f32 %v5732_v2, 0.0  ;;  %2018 = vst [vmem:[#allocation2 + $0x41] sm:$0xff] %v5732_v2  ;;  %v5738_v26 = vadd.f32 %v1846_v3, %v1782_v62  ;;  %v4868_v16 = vpop.f32.mrf.mxu1  ;;  %v4405_v17 = vpack.c.bf16 %v2231_v13, %v2231_v13  ;;  %2338 = vst [vmem:[#allocation3 + $0x70] sm:$0xf] %v4407_v12 }
 0x17d   : > { %2624 = vst [vmem:[#allocation3 + $0x40] sm:$0xf] %v4407_v12  ;;  %2481 = vst [vmem:[#allocation3 + $0x58] sm:$0xf] %v4407_v12  ;;  %v4847_v27 = vpop.f32.mrf.mxu0  ;;  %v5789_v54 = vadd.f32 %v4868_v16, %v5751_v55 }
 0x17e   : > { %v5743_v33 = vmax.f32 %v5738_v26, 0.0  ;;  %2016 = vst [vmem:[#allocation2 + $0x21] sm:$0xff] %v5738_v26  ;;  %v5746_v5 = vadd.f32 %v4847_v27, %v1803_v14  ;;  %v1987_v7 = vpop.f32.mrf.mxu1  ;;  %2336 = vst [vmem:[#allocation3 + $0x28] sm:$0xf] %v4405_v17  ;;  %v4408_v24 = vpack.c.bf16 %v5735_v56, %v5735_v56 }
 0x17f   : > { %2479 = vst [vmem:[#allocation3 + $0x10] sm:$0xf] %v4405_v17  ;;  %v1859_v57 = vpop.f32.mrf.mxu0  ;;  %v5755_v44 = vld [vmem:[#allocation2 + $0x30] sm:$0xff]  ;;  %v5793_v48 = vadd.f32 %v5751_v55, %v1987_v7 }
 0x180   : > { %v5757_v0 = vld [vmem:[#allocation2 + $0x32] sm:$0xff]  ;;  %v5760_v35 = vmax.f32 %v5746_v5, 0.0  ;;  %2021 = vst [vmem:[#allocation2 + $0x71] sm:$0xff] %v5746_v5  ;;  %v5763_v37 = vadd.f32 %v1859_v57, %v1795_v8  ;;  %v2050_v19 = vadd.f32 %v5755_v44, %v5718_v23  ;;  %v5767_v20 = vpop.f32.mrf.mxu1  ;;  %v4406_v52 = vpack.c.bf16 %v5743_v33, %v5743_v33  ;;  %2339 = vst [vmem:[#allocation3 + $0x94] sm:$0xf] %v4408_v24 }
 0x181   : > { %2241 = vst [vmem:[#allocation2 + $0x31] sm:$0xff] %v2233_v59  ;;  %2482 = vst [vmem:[#allocation3 + $0x7c] sm:$0xf] %v4408_v24  ;;  %v4848_v63 = vpop.f32.mrf.mxu0  ;;  %v2071_v28 = vld [vmem:[#allocation2 + $0x10] sm:$0xff] }
 0x182   : > { %2625 = vst [vmem:[#allocation3 + $0x64] sm:$0xf] %v4408_v24  ;;  %v2103_v36 = vld [vmem:[#allocation2 + $0x12] sm:$0xff]  ;;  %v5778_v60 = vmax.f32 %v5763_v37, 0.0  ;;  %2019 = vst [vmem:[#allocation2 + $0x51] sm:$0xff] %v5763_v37  ;;  %v5781_v49 = vadd.f32 %v4848_v63, %v1806_v29  ;;  %v2079_v21 = vadd.f32 %v2071_v28, %v2063_v31  ;;  %v2066_v38 = vadd.f32 %v5757_v0, %v2050_v19  ;;  %v2000_v40 = vpop.f32.mrf.mxu1 }
 0x183   : > { %2239 = vst [vmem:[#allocation2 + $0x11] sm:$0xff] %v2231_v13  ;;  %2337 = vst [vmem:[#allocation3 + $0x4c] sm:$0xf] %v4406_v52  ;;  %v1862_v43 = vpop.f32.mrf.mxu0  ;;  %v5784_v50 = vld [vmem:[#allocation2 + $0x40] sm:$0xff]  ;;  %v2048_v58 = vadd.f32 %v2071_v28, %v5724_v15  ;;  %v4411_v30 = vpack.c.bf16 %v5760_v35, %v5760_v35  ;;  %v5813_v10 = vadd.f32 %v5751_v55, %v2000_v40  ;;  %v2193_v28 = vpop.permute.xlu1 %2192 }
 0x184   : > { %2480 = vst [vmem:[#allocation3 + $0x34] sm:$0xf] %v4406_v52  ;;  %2623 = vst [vmem:[#allocation3 + $0x1c] sm:$0xf] %v4406_v52  ;;  %v5786_v53 = vld [vmem:[#allocation2 + $0x42] sm:$0xff]  ;;  %v5799_v59 = vmax.f32 %v5781_v49, 0.0  ;;  %v5801_v32 = vadd.f32 %v1862_v43, %v1798_v47  ;;  %v2095_v42 = vadd.f32 %v2079_v21, %v5724_v15  ;;  %v2082_v6 = vadd.f32 %v5784_v50, %v2066_v38  ;;  %v4872_v46 = vpop.f32.mrf.mxu1 }
 0x185   : > { %2022 = vst [vmem:[#allocation2 + $0x81] sm:$0xff] %v5781_v49  ;;  %2242 = vst [vmem:[#allocation2 + $0x41] sm:$0xff] %v5735_v56  ;;  %v2025_v61 = vld [vmem:[#allocation2 + $0x20] sm:$0xff]  ;;  %v2064_v22 = vadd.f32 %v2103_v36, %v2048_v58  ;;  %v2051_v9 = vadd.f32 %v5784_v50, %v5732_v2  ;;  %v4409_v13 = vpack.c.bf16 %v5778_v60, %v5778_v60 }
 0x186   : > { %v5808_v62 = vld [vmem:[#allocation2 + $0x22] sm:$0xff]  ;;  %2342 = vst [vmem:[#allocation3 + $0x100] sm:$0xf] %v4411_v30  ;;  %2628 = vst [vmem:[#allocation3 + $0xd0] sm:$0xf] %v4411_v30  ;;  %v5818_v15 = vmax.f32 %v5801_v32, 0.0  ;;  %v2049_v4 = vadd.f32 %v2025_v61, %v5738_v26  ;;  %v2111_v11 = vadd.f32 %v2103_v36, %v2095_v42  ;;  %v2098_v12 = vadd.f32 %v2082_v6, %v5732_v2 }
 0x187   : > { %2485 = vst [vmem:[#allocation3 + $0xe8] sm:$0xf] %v4411_v30  ;;  %2020 = vst [vmem:[#allocation2 + $0x61] sm:$0xff] %v5801_v32  ;;  %v2080_v41 = vadd.f32 %v2064_v22, %v2025_v61  ;;  %v5824_v45 = vld [vmem:[#allocation2 + $0x70] sm:$0xff]  ;;  %v2067_v3 = vadd.f32 %v5786_v53, %v2051_v9  ;;  %v5830_v56 = vadd.f32 %v4872_v46, %v5751_v55 }
 0x188   : > { %2240 = vst [vmem:[#allocation2 + $0x21] sm:$0xff] %v5743_v33  ;;  %v5826_v1 = vld [vmem:[#allocation2 + $0x72] sm:$0xff]  ;;  %2340 = vst [vmem:[#allocation3 + $0xb8] sm:$0xf] %v4409_v13  ;;  %v4435_v16 = vpack.c.bf16 %v5799_v59, %v5799_v59  ;;  %v2065_v17 = vadd.f32 %v5808_v62, %v2049_v4  ;;  %v2127_v25 = vadd.f32 %v2111_v11, %v2025_v61 }
 0x189   : > { %v2250_v14 = vld [vmem:[#allocation2 + $0x30] sm:$0xff]  ;;  %2626 = vst [vmem:[#allocation3 + $0x88] sm:$0xf] %v4409_v13  ;;  %2483 = vst [vmem:[#allocation3 + $0xa0] sm:$0xf] %v4409_v13  ;;  %v2114_v27 = vadd.f32 %v5786_v53, %v2098_v12  ;;  %v2054_v31 = vadd.f32 %v5824_v45, %v5746_v5  ;;  %v2096_v24 = vadd.f32 %v2080_v41, %v5738_v26 }
 0x18a   : > { %v2346_v33 = vld [vmem:[#allocation2 + $0x32] sm:$0xff]  ;;  %2245 = vst [vmem:[#allocation2 + $0x71] sm:$0xff] %v5760_v35  ;;  %v4399_v29 = vpack.c.bf16 %v2250_v14, %v2250_v14  ;;  %v4410_v52 = vpack.c.bf16 %v5818_v15, %v5818_v15  ;;  %2486 = vst [vmem:[#allocation3 + $0x10c] sm:$0xf] %v4435_v16  ;;  %v2081_v63 = vadd.f32 %v5755_v44, %v2065_v17  ;;  %v2183_v14 = vpop.permute.xlu0 %2182 }
 0x18b   : > { %v2122_v8 = vld [vmem:[#allocation2 + $0x50] sm:$0xff]  ;;  %v4415_v19 = vpack.c.bf16 %v2346_v33, %v2346_v33  ;;  %2629 = vst [vmem:[#allocation3 + $0xf4] sm:$0xf] %v4435_v16  ;;  %v2143_v47 = vadd.f32 %v2127_v25, %v5738_v26  ;;  %v2112_v38 = vadd.f32 %v2096_v24, %v5808_v62  ;;  %v2070_v58 = vadd.f32 %v5826_v1, %v2054_v31 }
 0x18c   : > { %v2154_v7 = vld [vmem:[#allocation2 + $0x52] sm:$0xff]  ;;  %v2130_v36 = vadd.f32 %v2122_v8, %v2114_v27  ;;  %v2052_v35 = vadd.f32 %v2122_v8, %v5763_v37  ;;  %v2083_v40 = vadd.f32 %v2122_v8, %v2067_v3  ;;  %v5848_v30 = vld [vmem:[#allocation2 + $0x80] sm:$0xff]  ;;  %2290 = vst [vmem:[#allocation3 + $0x6c] sm:$0xf] %v4399_v29  ;;  %2433 = vst [vmem:[#allocation3 + $0x54] sm:$0xf] %v4399_v29  ;;  %v5869_v8 = vpop.permute.xlu1 %2202 }
 0x18d   : > { %v2248_v57 = vld [vmem:[#allocation2 + $0x10] sm:$0xff]  ;;  %2243 = vst [vmem:[#allocation2 + $0x51] sm:$0xff] %v5778_v60  ;;  %v5850_v42 = vld [vmem:[#allocation2 + $0x82] sm:$0xff]  ;;  %2386 = vst [vmem:[#allocation3 + $0x74] sm:$0xf] %v4415_v19  ;;  %v2097_v26 = vadd.f32 %v2081_v63, %v5718_v23  ;;  %v2159_v60 = vadd.f32 %v2143_v47, %v5808_v62  ;;  %v2128_v61 = vadd.f32 %v2112_v38, %v5755_v44 }
 0x18e   : > { %v2344_v21 = vld [vmem:[#allocation2 + $0x12] sm:$0xff]  ;;  %v4397_v43 = vpack.c.bf16 %v2248_v57, %v2248_v57  ;;  %2341 = vst [vmem:[#allocation3 + $0xdc] sm:$0xf] %v4410_v52  ;;  %2576 = vst [vmem:[#allocation3 + $0x3c] sm:$0xf] %v4399_v29  ;;  %v2146_v6 = vadd.f32 %v2130_v36, %v5763_v37  ;;  %v2068_v46 = vadd.f32 %v2154_v7, %v2052_v35  ;;  %v2076_v22 = vld [vmem:[#allocation2 + $0x60] sm:$0xff] }
 0x18f   : > { %2529 = vst [vmem:[#allocation3 + $0x5c] sm:$0xf] %v4415_v19  ;;  %2484 = vst [vmem:[#allocation3 + $0xc4] sm:$0xf] %v4410_v52  ;;  %v5857_v9 = vld [vmem:[#allocation2 + $0x62] sm:$0xff]  ;;  %v2099_v13 = vadd.f32 %v2083_v40, %v5763_v37  ;;  %v2086_v4 = vadd.f32 %v5848_v30, %v2070_v58  ;;  %v4413_v12 = vpack.c.bf16 %v2344_v21, %v2344_v21  ;;  %v2142_v29 = vld [vmem:[#allocation2 + $0x91] sm:$0xff] }
 0x190   : > { %2627 = vst [vmem:[#allocation3 + $0xac] sm:$0xf] %v4410_v52  ;;  %2672 = vst [vmem:[#allocation3 + $0x44] sm:$0xf] %v4415_v19  ;;  %v2249_v11 = vld [vmem:[#allocation2 + $0x20] sm:$0xff]  ;;  %v2113_v62 = vadd.f32 %v5757_v0, %v2097_v26  ;;  %v2215_v41 = vmul.f32 %v2178_v18, %v2159_v60  ;;  %v2162_v3 = vadd.f32 %v2154_v7, %v2146_v6  ;;  %v5151_v40 = vld [vmem:[#allocation7 + $0x3b0] sm:$0xff]   ;;  %v2198_v60 = vpop.permute.xlu0 %2197 }
 0x191   : > { %2246 = vst [vmem:[#allocation2 + $0x81] sm:$0xff] %v5799_v59  ;;  %2288 = vst [vmem:[#allocation3 + $0x24] sm:$0xf] %v4397_v43  ;;  %v2084_v16 = vadd.f32 %v2076_v22, %v2068_v46  ;;  %v2345_v59 = vld [vmem:[#allocation2 + $0x22] sm:$0xff]  ;;  %v2144_v44 = vadd.f32 %v2128_v61, %v5718_v23  ;;  %v2115_v17 = vadd.f32 %v2154_v7, %v2099_v13  ;;  %v2350_v26 = vld [vmem:[#allocation2 + $0x72] sm:$0xff] }
 0x192   : > { %2431 = vst [vmem:[#allocation3 + $0xc] sm:$0xf] %v4397_v43  ;;  %2244 = vst [vmem:[#allocation2 + $0x61] sm:$0xff] %v5818_v15  ;;  %v2102_v37 = vadd.f32 %v2086_v4, %v5781_v49  ;;  %v4398_v25 = vpack.c.bf16 %v2249_v11, %v2249_v11  ;;  %v2394_v27 = vld [vmem:[#allocation2 + $0x40] sm:$0xff]  ;;  %v2129_v31 = vadd.f32 %v5784_v50, %v2113_v62  ;;  %v2126_v15 = vld [vmem:[#allocation2 + $0x90] sm:$0xff] }
 0x193   : > { %2384 = vst [vmem:[#allocation3 + $0x2c] sm:$0xf] %v4413_v12  ;;  %2527 = vst [vmem:[#allocation3 + $0x14] sm:$0xf] %v4413_v12  ;;  %v5867_v33 = vadd.f32 %v2215_v41, %v5775_v34  ;;  %v2218_v18 = vmul.f32 %v2193_v28, %v2162_v3  ;;  %v2100_v24 = vadd.f32 %v2084_v16, %v5801_v32  ;;  %v2347_v50 = vld [vmem:[#allocation2 + $0x42] sm:$0xff]  ;;  %v5145_v28 = vld [vmem:[#allocation7 + $0x378] sm:$0xff]   ;;  %v2213_v3 = vpop.permute.xlu1 %2212 }
 0x194   : > { %6054 = vst [vmem:[#allocation15_spill] sm:$0xff] %v5869_v8  ;;  %v2160_v23 = vadd.f32 %v2144_v44, %v5757_v0  ;;  %v2131_v7 = vadd.f32 %v2115_v17, %v2076_v22  ;;  %v2118_v57 = vadd.f32 %v5850_v42, %v2102_v37  ;;  %2289 = vst [vmem:[#allocation3 + $0x48] sm:$0xf] %v4398_v25  ;;  %v2252_v52 = vld [vmem:[#allocation2 + $0x50] sm:$0xff]  ;;  %v5141_v46 = vld [vmem:[#allocation3 + $0x4] ss:$36 sps:$4 sm:$0xff]  }
 0x195   : > { %6053 = vst [vmem:[#allocation13_spill] sm:$0xff] %v5867_v33  ;;  %2432 = vst [vmem:[#allocation3 + $0x30] sm:$0xf] %v4398_v25  ;;  %v4414_v19 = vpack.c.bf16 %v2345_v59, %v2345_v59  ;;  %v2145_v34 = vadd.f32 %v2129_v31, %v5732_v2  ;;  %v5876_v63 = vadd.f32 %v2218_v18, %v5789_v54  ;;  %v2254_v0 = vld [vmem:[#allocation2 + $0x70] sm:$0xff]  ;;  %3520 = vmatprep.mubr.bf16.mxu0 %v5141_v46  ;;  %v5156_v17 = vld [vmem:[#allocation7 + $0x3f8] sm:$0xff]  }
 0x196   : > { %2575 = vst [vmem:[#allocation3 + $0x18] sm:$0xf] %v4398_v25  ;;  %v2116_v47 = vadd.f32 %v5857_v9, %v2100_v24  ;;  %v4423_v36 = vpack.c.bf16 %v2394_v27, %v2394_v27  ;;  %v2216_v35 = vmul.f32 %v2183_v14, %v2160_v23  ;;  %v2147_v21 = vadd.f32 %v2131_v7, %v5801_v32  ;;  %v2348_v58 = vld [vmem:[#allocation2 + $0x52] sm:$0xff] }
 0x197   : > { %6055 = vst [vmem:[#allocation14_spill] sm:$0xff] %v5876_v63  ;;  %v2134_v38 = vadd.f32 %v2126_v15, %v2118_v57  ;;  %2385 = vst [vmem:[#allocation3 + $0x50] sm:$0xf] %v4414_v19  ;;  %v2053_v43 = vadd.f32 %v2076_v22, %v5801_v32  ;;  %v2161_v2 = vadd.f32 %v5786_v53, %v2145_v34  ;;  %v5155_v14 = vld [vmem:[#allocation7 + $0x370] sm:$0xff]   ;;  %v5157_v15 = vld [vmem:[#allocation7 + $0x3a8] sm:$0xff]  }
 0x198   : > { %2528 = vst [vmem:[#allocation3 + $0x38] sm:$0xf] %v4414_v19  ;;  %2671 = vst [vmem:[#allocation3 + $0x20] sm:$0xf] %v4414_v19  ;;  %v2132_v54 = vadd.f32 %v5824_v45, %v2116_v47  ;;  %v5139_v6 = vld [vmem:[#allocation3] ss:$36 sps:$4 sm:$0xff]   ;;  %v4401_v61 = vpack.c.bf16 %v2252_v52, %v2252_v52  ;;  %v4416_v13 = vpack.c.bf16 %v2347_v50, %v2347_v50 }
 0x199   : > { %2434 = vst [vmem:[#allocation3 + $0x78] sm:$0xf] %v4423_v36  ;;  %2291 = vst [vmem:[#allocation3 + $0x90] sm:$0xf] %v4423_v36  ;;  %v5884_v4 = vadd.f32 %v2216_v35, %v5793_v48  ;;  %v2163_v32 = vadd.f32 %v2147_v21, %v5857_v9  ;;  %v2150_v22 = vadd.f32 %v2142_v29, %v2134_v38  ;;  %v2396_v12 = vld [vmem:[#allocation2 + $0x60] sm:$0xff]  ;;  %v5228_v44 = vld [vmem:[#allocation2 + $0x92] sm:$0xff]  ;;  %3521 = vmatmul.mubr.bf16.vlgmr.msra.gmra.mxu0 %v5139_v6 }
 0x19a   : > { %2577 = vst [vmem:[#allocation3 + $0x60] sm:$0xf] %v4423_v36  ;;  %v2069_v11 = vadd.f32 %v5857_v9, %v2053_v43  ;;  %v2349_v53 = vld [vmem:[#allocation2 + $0x62] sm:$0xff]  ;;  %v2217_v62 = vmul.f32 %v5803_v39, %v2161_v2  ;;  %v2148_v41 = vadd.f32 %v2132_v54, %v5746_v5  ;;  %2292 = vst [vmem:[#allocation3 + $0xb4] sm:$0xf] %v4401_v61  ;;  %4734 = vmatpush3.bf16.msra.mxu0 %v5145_v28  ;;  %v5158_v23 = vld [vmem:[#allocation7 + $0x430] sm:$0xff]  }
 0x19b   : > { %6056 = vst [vmem:[#allocation16_spill] sm:$0xff] %v5884_v4  ;;  %v4417_v16 = vpack.c.bf16 %v2348_v58, %v2348_v58  ;;  %2387 = vst [vmem:[#allocation3 + $0x98] sm:$0xf] %v4416_v13  ;;  %v4425_v59 = vpack.c.bf16 %v2396_v12, %v2396_v12  ;;  %v2219_v48 = vmul.f32 %v2198_v60, %v2163_v32  ;;  %v2398_v25 = vld [vmem:[#allocation2 + $0x80] sm:$0xff]  ;;  %v5146_v24 = vld [vmem:[#allocation3 + $0x4c] ss:$36 sps:$4 sm:$0xff]   ;;  %4735 = vmatprep.subr.bf16.mxu0 %v5151_v40  ;;  %v2208_v58 = vpop.permute.xlu0 %2207 }
 0x19c   : > { %2435 = vst [vmem:[#allocation3 + $0x9c] sm:$0xf] %v4401_v61  ;;  %2530 = vst [vmem:[#allocation3 + $0x80] sm:$0xf] %v4416_v13  ;;  %v2166_v9 = vadd.f32 %v5228_v44, %v2150_v22  ;;  %v2085_v39 = vadd.f32 %v5824_v45, %v2069_v11  ;;  %v4403_v37 = vpack.c.bf16 %v2254_v0, %v2254_v0  ;;  %v2494_v27 = vld [vmem:[#allocation2 + $0x82] sm:$0xff]  ;;  %3528 = vmatprep.mubr.bf16.mxu0 %v5146_v24  ;;  %v2694_v36 = vld [vmem:[#allocation3 + $0x6c] sm:$0xff] }
 0x19d   : > { %2578 = vst [vmem:[#allocation3 + $0x84] sm:$0xf] %v4401_v61  ;;  %2673 = vst [vmem:[#allocation3 + $0x68] sm:$0xf] %v4416_v13  ;;  %v5892_v31 = vadd.f32 %v2217_v62, %v5772_v51  ;;  %v5895_v18 = vadd.f32 %v5826_v1, %v2148_v41  ;;  %v4418_v7 = vpack.c.bf16 %v2349_v53, %v2349_v53  ;;  %v5148_v29 = vld [vmem:[#allocation3 + $0x8] ss:$36 sps:$4 sm:$0xff]  }
 0x19e   : > { %2388 = vst [vmem:[#allocation3 + $0xbc] sm:$0xf] %v4417_v16  ;;  %2436 = vst [vmem:[#allocation3 + $0xc0] sm:$0xf] %v4425_v59  ;;  %v4419_v57 = vpack.c.bf16 %v2350_v26, %v2350_v26  ;;  %v5898_v45 = vadd.f32 %v2219_v48, %v5813_v10  ;;  %v2222_v51 = vmul.f32 %v2213_v3, %v2166_v9  ;;  %v5150_v19 = vld [vmem:[#allocation3 + $0xc] ss:$36 sps:$4 sm:$0xff]   ;;  %4736 = vmatpush3.bf16.msra.mxu0 %v5155_v14 }
 0x19f   : > { %6057 = vst [vmem:[#allocation17_spill] sm:$0xff] %v5892_v31  ;;  %6058 = vst [vmem:[#allocation18_spill] sm:$0xff] %v5895_v18  ;;  %v2101_v52 = vadd.f32 %v2085_v39, %v5746_v5  ;;  %v2689_v50 = vld [vmem:[#allocation3 + $0x48] sm:$0xff]  ;;  %v4427_v34 = vpack.c.bf16 %v2398_v25, %v2398_v25  ;;  %v4443_v47 = vpack.c.bf16 %v2494_v27, %v2494_v27  ;;  %3585 = vmatprep.mubr.bf16.mxu1 %v5150_v19  ;;  %v5162_v38 = vld [vmem:[#allocation7 + $0x3f0] sm:$0xff]  }
 0x1a0   : > { %2293 = vst [vmem:[#allocation3 + $0xd8] sm:$0xf] %v4425_v59  ;;  %2531 = vst [vmem:[#allocation3 + $0xa4] sm:$0xf] %v4417_v16  ;;  %v5902_v10 = vadd.f32 %v2222_v51, %v5830_v56  ;;  %v5153_v28 = vld [vmem:[#allocation3 + $0x54] ss:$36 sps:$4 sm:$0xff]   ;;  %3586 = vmatmul.mubr.bf16.vlgmr.msra.gmra.mxu1 %v5148_v29  ;;  %v4219_v21 = vcombine.low %v2689_v50, %v2694_v36  ;;  %4737 = vmatprep.subr.bf16.mxu0 %v5157_v15 }
 0x1a1   : > { %2579 = vst [vmem:[#allocation3 + $0xa8] sm:$0xf] %v4425_v59  ;;  %2674 = vst [vmem:[#allocation3 + $0x8c] sm:$0xf] %v4417_v16  ;;  %v2117_v5 = vadd.f32 %v5826_v1, %v2101_v52  ;;  %v5161_v0 = vld [vmem:[#allocation7 + $0x368] sm:$0xff]   ;;  %3593 = vmatprep.mubr.bf16.mxu1 %v5153_v28  ;;  %4774 = vmatpush3.bf16.msra.mxu1 %v5156_v17  ;;  %v5164_v56 = vld [vmem:[#allocation7 + $0x3a0] sm:$0xff]   ;;  %v2009_v60 = vadd.f32 %v5767_v20, %v5751_v55 }
 0x1a2   : > { %6059 = vst [vmem:[#allocation19_spill] sm:$0xff] %v5898_v45  ;;  %2294 = vst [vmem:[#allocation3 + $0xfc] sm:$0xf] %v4403_v37  ;;  %4775 = vmatprep.subr.bf16.mxu1 %v5158_v23  ;;  %v5159_v40 = vld [vmem:[#allocation3 + $0x94] ss:$36 sps:$4 sm:$0xff]   ;;  %v5165_v43 = vld [vmem:[#allocation7 + $0x428] sm:$0xff]   ;;  %3529 = vmatmul.mubr.bf16.gmra.mxu0 %v4219_v21 }
 0x1a3   : > { %2437 = vst [vmem:[#allocation3 + $0xe4] sm:$0xf] %v4403_v37  ;;  %2580 = vst [vmem:[#allocation3 + $0xcc] sm:$0xf] %v4403_v37  ;;  %v2133_v35 = vadd.f32 %v2117_v5, %v5848_v30  ;;  %3536 = vmatprep.mubr.bf16.mxu0 %v5159_v40  ;;  %4738 = vmatpush3.bf16.msra.mxu0 %v5161_v0  ;;  %v5168_v26 = vld [vmem:[#allocation7 + $0x360] sm:$0xff]   ;;  %v5169_v2 = vld [vmem:[#allocation7 + $0x3e8] sm:$0xff]  }
 0x1a4   : > { %2389 = vst [vmem:[#allocation3 + $0xe0] sm:$0xf] %v4418_v7  ;;  %2390 = vst [vmem:[#allocation3 + $0x104] sm:$0xf] %v4419_v57  ;;  %v5170_v54 = vld [vmem:[#allocation7 + $0x398] sm:$0xff]   ;;  %4739 = vmatprep.subr.bf16.mxu0 %v5164_v56  ;;  %v5171_v61 = vld [vmem:[#allocation7 + $0x420] sm:$0xff]  }
 0x1a5   : > { %2532 = vst [vmem:[#allocation3 + $0xc8] sm:$0xf] %v4418_v7  ;;  %2533 = vst [vmem:[#allocation3 + $0xec] sm:$0xf] %v4419_v57  ;;  %v2149_v1 = vadd.f32 %v2133_v35, %v5781_v49  ;;  %4776 = vmatpush3.bf16.msra.mxu1 %v5162_v38  ;;  %v2704_v6 = vld [vmem:[#allocation3 + $0xb4] sm:$0xff]  ;;  %v5175_v11 = vld [vmem:[#allocation7 + $0x3e0] sm:$0xff]  }
 0x1a6   : > { %2675 = vst [vmem:[#allocation3 + $0xb0] sm:$0xf] %v4418_v7  ;;  %2676 = vst [vmem:[#allocation3 + $0xd4] sm:$0xf] %v4419_v57  ;;  %v5163_v46 = vld [vmem:[#allocation3 + $0x50] ss:$36 sps:$4 sm:$0xff]   ;;  %4777 = vmatprep.subr.bf16.mxu1 %v5165_v43 }
 0x1a7   : > { %6060 = vst [vmem:[#allocation20_spill] sm:$0xff] %v5902_v10  ;;  %2438 = vst [vmem:[#allocation3 + $0x108] sm:$0xf] %v4427_v34  ;;  %v2165_v30 = vadd.f32 %v2149_v1, %v5850_v42  ;;  %v5166_v49 = vld [vmem:[#allocation3 + $0x9c] ss:$36 sps:$4 sm:$0xff]   ;;  %v2699_v22 = vld [vmem:[#allocation3 + $0x90] sm:$0xff]  ;;  %4740 = vmatpush3.bf16.msra.mxu0 %v5168_v26 }
 0x1a8   : > { %2534 = vst [vmem:[#allocation3 + $0x110] sm:$0xf] %v4443_v47  ;;  %2581 = vst [vmem:[#allocation3 + $0xf0] sm:$0xf] %v4427_v34  ;;  %v5174_v32 = vld [vmem:[#allocation7 + $0x358] sm:$0xff]   ;;  %3594 = vmatmul.mubr.bf16.gmra.mxu1 %v5163_v46  ;;  %v4228_v55 = vcombine.low %v2699_v22, %v2704_v6  ;;  %v5177_v20 = vld [vmem:[#allocation7 + $0x390] sm:$0xff]   ;;  %4741 = vmatprep.subr.bf16.mxu0 %v5170_v54 }
 0x1a9   : > { %2677 = vst [vmem:[#allocation3 + $0xf8] sm:$0xf] %v4443_v47  ;;  %v2221_v13 = vmul.f32 %v2208_v58, %v2165_v30  ;;  %3601 = vmatprep.mubr.bf16.mxu1 %v5166_v49  ;;  %4778 = vmatpush3.bf16.msra.mxu1 %v5169_v2  ;;  %v5172_v42 = vld [vmem:[#allocation3 + $0xdc] ss:$36 sps:$4 sm:$0xff]   ;;  %v5181_v62 = vld [vmem:[#allocation7 + $0x350] sm:$0xff]   ;;  %v5183_v3 = vld [vmem:[#allocation7 + $0x388] sm:$0xff]  }
 0x1aa   : > { %4779 = vmatprep.subr.bf16.mxu1 %v5171_v61  ;;  %v5178_v53 = vld [vmem:[#allocation7 + $0x418] sm:$0xff]   ;;  %3537 = vmatmul.mubr.bf16.gmra.mxu0 %v4228_v55  ;;  %v5184_v14 = vld [vmem:[#allocation7 + $0x410] sm:$0xff]   ;;  %v5185_v9 = vld [vmem:[#allocation7 + $0x348] sm:$0xff]  }
 0x1ab   : > { %v5910_v12 = vadd.f32 %v2221_v13, %v2009_v60  ;;  %v5182_v41 = vld [vmem:[#allocation7 + $0x3d8] sm:$0xff]   ;;  %3544 = vmatprep.mubr.bf16.mxu0 %v5172_v42  ;;  %4742 = vmatpush3.bf16.msra.mxu0 %v5174_v32  ;;  %v5189_v39 = vld [vmem:[#allocation7 + $0x3d0] sm:$0xff]   ;;  %v5191_v37 = vld [vmem:[#allocation7 + $0x380] sm:$0xff]  }
 0x1ac   : > { %v2709_v16 = vld [vmem:[#allocation3 + $0xd8] sm:$0xff]  ;;  %4743 = vmatprep.subr.bf16.mxu0 %v5177_v20  ;;  %v5192_v27 = vld [vmem:[#allocation7 + $0x408] sm:$0xff]   ;;  %v5193_v24 = vld [vmem:[#allocation7 + $0x340] sm:$0xff]   ;;  %v5912_v20 = vpop.f32.mrf.mxu1 }
 0x1ad   : > { %6061 = vst [vmem:[#allocation21_spill] sm:$0xff] %v5910_v12  ;;  %4780 = vmatpush3.bf16.msra.mxu1 %v5175_v11  ;;  %v5176_v59 = vld [vmem:[#allocation3 + $0x98] ss:$36 sps:$4 sm:$0xff]   ;;  %v5194_v15 = vld [vmem:[#allocation7 + $0x3c8] sm:$0xff]   ;;  %v5190_v23 = vld [vmem:[#allocation3 + $0xe0] ss:$36 sps:$4 sm:$0xff]  }
 0x1ae   : > { %4781 = vmatprep.subr.bf16.mxu1 %v5178_v53  ;;  %v5179_v48 = vld [vmem:[#allocation3 + $0xe4] ss:$36 sps:$4 sm:$0xff]   ;;  %v2714_v44 = vld [vmem:[#allocation3 + $0xfc] sm:$0xff]  ;;  %v5188_v25 = vld [vmem:[#allocation3 + $0x14] ss:$36 sps:$4 sm:$0xff]   ;;  %6062 = vst [vmem:[#allocation22_spill] sm:$0xff] %v5912_v20 }
 0x1af   : > { %4744 = vmatpush3.bf16.msra.mxu0 %v5181_v62  ;;  %v4237_v17 = vcombine.low %v2709_v16, %v2714_v44  ;;  %v5198_v7 = vld [vmem:[#allocation7 + $0x400] sm:$0xff]   ;;  %v5199_v57 = vld [vmem:[#allocation7 + $0x478] sm:$0xff]   ;;  %v5186_v29 = vld [vmem:[#allocation3 + $0x10] ss:$36 sps:$4 sm:$0xff]  }
 0x1b0   : > { %3602 = vmatmul.mubr.bf16.gmra.mxu1 %v5176_v59  ;;  %4745 = vmatprep.subr.bf16.mxu0 %v5183_v3  ;;  %v5197_v51 = vld [vmem:[#allocation3 + $0x1c] ss:$36 sps:$4 sm:$0xff]   ;;  %v5203_v52 = vld [vmem:[#allocation7 + $0x470] sm:$0xff]   ;;  %v5206_v28 = vld [vmem:[#allocation7 + $0x468] sm:$0xff]  }
 0x1b1   : > { %3609 = vmatprep.mubr.bf16.mxu1 %v5179_v48  ;;  %4782 = vmatpush3.bf16.msra.mxu1 %v5182_v41  ;;  %v5202_v19 = vld [vmem:[#allocation7 + $0x3c0] sm:$0xff]   ;;  %v5195_v34 = vld [vmem:[#allocation3 + $0x18] ss:$36 sps:$4 sm:$0xff]   ;;  %v5211_v43 = vld [vmem:[#allocation3 + $0xac] ss:$36 sps:$4 sm:$0xff]  }
 0x1b2   : > { %4783 = vmatprep.subr.bf16.mxu1 %v5184_v14  ;;  %3545 = vmatmul.mubr.bf16.gmra.mxu0 %v4237_v17  ;;  %v5200_v50 = vld [vmem:[#allocation3 + $0x5c] ss:$36 sps:$4 sm:$0xff]   ;;  %v5204_v5 = vld [vmem:[#allocation3 + $0x64] ss:$36 sps:$4 sm:$0xff]   ;;  %v5217_v26 = vld [vmem:[#allocation7 + $0x450] sm:$0xff]  }
 0x1b3   : > { %4746 = vmatpush3.bf16.msra.mxu0 %v5185_v9  ;;  %3650 = vmatprep.mubr.bf16.mxu0 %v5188_v25  ;;  %v2696_v47 = vld [vmem:[#allocation3 + $0x7c] sm:$0xff]  ;;  %v5207_v21 = vld [vmem:[#allocation3 + $0xa4] ss:$36 sps:$4 sm:$0xff]   ;;  %v5214_v2 = vld [vmem:[#allocation3 + $0xec] ss:$36 sps:$4 sm:$0xff]  }
 0x1b4   : > { %4747 = vmatprep.subr.bf16.mxu0 %v5191_v37  ;;  %v2691_v36 = vld [vmem:[#allocation3 + $0x58] sm:$0xff]  ;;  %v5210_v35 = vld [vmem:[#allocation7 + $0x460] sm:$0xff]   ;;  %v5216_v54 = vld [vmem:[#allocation3 + $0xa8] ss:$36 sps:$4 sm:$0xff]  }
 0x1b5   : > { %4784 = vmatpush3.bf16.msra.mxu1 %v5189_v39  ;;  %v4223_v0 = vcombine.low %v2691_v36, %v2696_v47  ;;  %v2706_v38 = vld [vmem:[#allocation3 + $0xc4] sm:$0xff]  ;;  %v5213_v40 = vld [vmem:[#allocation7 + $0x458] sm:$0xff]   ;;  %v5223_v13 = vld [vmem:[#allocation3 + $0xf0] ss:$36 sps:$4 sm:$0xff]  }
 0x1b6   : > { %4785 = vmatprep.subr.bf16.mxu1 %v5192_v27  ;;  %v5209_v56 = vld [vmem:[#allocation3 + $0x60] ss:$36 sps:$4 sm:$0xff]   ;;  %v5221_v60 = vld [vmem:[#allocation7 + $0x448] sm:$0xff]   ;;  %v5218_v30 = vld [vmem:[#allocation3 + $0xf4] ss:$36 sps:$4 sm:$0xff]  }
 0x1b7   : > { %4748 = vmatpush3.bf16.msra.mxu0 %v5193_v24  ;;  %v2701_v1 = vld [vmem:[#allocation3 + $0xa0] sm:$0xff]  ;;  %v5220_v6 = vld [vmem:[#allocation3 + $0xe8] ss:$36 sps:$4 sm:$0xff]   ;;  %v5225_v49 = vld [vmem:[#allocation3 + $0xb0] ss:$36 sps:$4 sm:$0xff]  }
 0x1b8   : > { %3610 = vmatmul.mubr.bf16.gmra.mxu1 %v5190_v23  ;;  %4873 = vmatprep.subr.bf16.mxu0 %v5199_v57  ;;  %v4232_v58 = vcombine.low %v2701_v1, %v2706_v38  ;;  %v5224_v46 = vld [vmem:[#allocation7 + $0x440] sm:$0xff]   ;;  %v5226_v32 = vld [vmem:[#allocation3 + $0x68] ss:$36 sps:$4 sm:$0xff]   ;;  %v5227_v22 = vld [vmem:[#allocation3 + $0xf8] ss:$36 sps:$4 sm:$0xff]  }
 0x1b9   : > { %4786 = vmatpush3.bf16.msra.mxu1 %v5194_v15  ;;  %3715 = vmatprep.mubr.bf16.mxu1 %v5197_v51  ;;  %v5222_v61 = vld [vmem:[#allocation3 + $0x20] ss:$36 sps:$4 sm:$0xff]  }
 0x1ba   : > { %4787 = vmatprep.subr.bf16.mxu1 %v5198_v7  ;;  %3651 = vmatmul.mubr.bf16.vlgmr.msra.gmra.mxu0 %v5186_v29 }
 0x1bb   : > { %3658 = vmatprep.mubr.bf16.mxu0 %v5200_v50  ;;  %4874 = vmatpush3.bf16.msra.mxu0 %v5199_v57 }
 0x1bc   : > { %4875 = vmatprep.subr.bf16.mxu0 %v5203_v52 }
 0x1bd   : > { %4788 = vmatpush3.bf16.msra.mxu1 %v5202_v19 }
 0x1be   : > { %4897 = vmatprep.subr.bf16.mxu1 %v5199_v57 }
 0x1bf   : > { %4876 = vmatpush3.bf16.msra.mxu0 %v5203_v52 }
 0x1c0   : > { %3716 = vmatmul.mubr.bf16.vlgmr.msra.gmra.mxu1 %v5195_v34  ;;  %4877 = vmatprep.subr.bf16.mxu0 %v5206_v28 }
 0x1c1   : > { %3723 = vmatprep.mubr.bf16.mxu1 %v5204_v5  ;;  %4905 = vmatpush3.bf16.msra.mxu1 %v5199_v57 }
 0x1c2   : > { %4898 = vmatprep.subr.bf16.mxu1 %v5203_v52  ;;  %3659 = vmatmul.mubr.bf16.gmra.mxu0 %v4223_v0 }
 0x1c3   : > { %3666 = vmatprep.mubr.bf16.mxu0 %v5207_v21  ;;  %4878 = vmatpush3.bf16.msra.mxu0 %v5206_v28 }
 0x1c4   : > { %4879 = vmatprep.subr.bf16.mxu0 %v5210_v35 }
 0x1c5   : > { %4906 = vmatpush3.bf16.msra.mxu1 %v5203_v52 }
 0x1c6   : > { %4899 = vmatprep.subr.bf16.mxu1 %v5206_v28 }
 0x1c7   : > { %4880 = vmatpush3.bf16.msra.mxu0 %v5210_v35 }
 0x1c8   : > { %3724 = vmatmul.mubr.bf16.gmra.mxu1 %v5209_v56  ;;  %4881 = vmatprep.subr.bf16.mxu0 %v5213_v40 }
 0x1c9   : > { %3731 = vmatprep.mubr.bf16.mxu1 %v5211_v43  ;;  %4907 = vmatpush3.bf16.msra.mxu1 %v5206_v28 }
 0x1ca   : > { %4900 = vmatprep.subr.bf16.mxu1 %v5210_v35  ;;  %3667 = vmatmul.mubr.bf16.gmra.mxu0 %v4232_v58 }
 0x1cb   : > { %3674 = vmatprep.mubr.bf16.mxu0 %v5214_v2  ;;  %4882 = vmatpush3.bf16.msra.mxu0 %v5213_v40 }
 0x1cc   : > { %4883 = vmatprep.subr.bf16.mxu0 %v5217_v26 }
 0x1cd   : > { %4908 = vmatpush3.bf16.msra.mxu1 %v5210_v35 }
 0x1ce   : > { %4901 = vmatprep.subr.bf16.mxu1 %v5213_v40 }
 0x1cf   : > { %4884 = vmatpush3.bf16.msra.mxu0 %v5217_v26 }
 0x1d0   : > { %3732 = vmatmul.mubr.bf16.gmra.mxu1 %v5216_v54  ;;  %4885 = vmatprep.subr.bf16.mxu0 %v5221_v60 }
 0x1d1   : > { %3739 = vmatprep.mubr.bf16.mxu1 %v5218_v30  ;;  %4909 = vmatpush3.bf16.msra.mxu1 %v5213_v40 }
 0x1d2   : > { %4902 = vmatprep.subr.bf16.mxu1 %v5217_v26  ;;  %3675 = vmatmul.mubr.bf16.gmra.mxu0 %v5220_v6 }
 0x1d3   : > { %4886 = vmatpush3.bf16.msra.mxu0 %v5221_v60  ;;  %4889 = vmatprep.mubr.bf16.mxu0 %v5222_v61 }
 0x1d4   : > { %4887 = vmatprep.subr.bf16.mxu0 %v5224_v46 }
 0x1d5   : > { %4910 = vmatpush3.bf16.msra.mxu1 %v5217_v26 }
 0x1d6   : > { %4903 = vmatprep.subr.bf16.mxu1 %v5221_v60 }
 0x1d7   : > { %4888 = vmatpush3.bf16.msra.mxu0 %v5224_v46 }
 0x1d8   : > { %3740 = vmatmul.mubr.bf16.gmra.mxu1 %v5223_v13 }
 0x1d9   : > { %4911 = vmatpush3.bf16.msra.mxu1 %v5221_v60  ;;  %4893 = vmatprep.mubr.bf16.mxu1 %v5225_v49  ;;  %v4209_v49 = vld [vmem:[%s6028_s4 + $0x2] ss:$0 sm:$0xff] }
 0x1da   : > { %4904 = vmatprep.subr.bf16.mxu1 %v5224_v46  ;;  %4890 = vmatmul.mubr.bf16.vlgmr.msra.gmra.mxu0 %v5226_v32 }
 0x1dd   : > { %4912 = vmatpush3.bf16.msra.mxu1 %v5224_v46 }
 0x1e0   : > { %4894 = vmatmul.mubr.bf16.vlgmr.msra.gmra.mxu1 %v5227_v22 }
 0x259   : > { %v4669_v11 = vpop.f32.mrf.mxu0 }
 0x25b   : > { %v4670_v55 = vpop.f32.mrf.mxu0 }
 0x25c   : > { %v4671_v61 = vadd.f32 %v4670_v55, %v4669_v11 }
 0x25d   : > { %v4672_v42 = vpop.f32.mrf.mxu0 }
 0x25e   : > { %v3523_v8 = vadd.f32 %v4671_v61, %v4209_v49  ;;  %v5229_v61 = vld [vmem:[%s5525_s17 + $0x10] sm:$0xff] }
 0x25f   : > { %v4673_v62 = vpop.f32.mrf.mxu0 }
 0x260   : > { %v4709_v53 = vpop.f32.mrf.mxu1  ;;  %v4674_v32 = vadd.f32 %v4673_v62, %v4672_v42 }
 0x262   : > { %v4710_v41 = vpop.f32.mrf.mxu1  ;;  %v4675_v3 = vpop.f32.mrf.mxu0  ;;  %v3526_v11 = vadd.f32 %v4674_v32, %v4209_v49 }
 0x263   : > { %v4711_v10 = vadd.f32 %v4710_v41, %v4709_v53 }
 0x264   : > { %v4712_v14 = vpop.f32.mrf.mxu1  ;;  %v4676_v16 = vpop.f32.mrf.mxu0 }
 0x265   : > { %v4677_v45 = vadd.f32 %v4676_v16, %v4675_v3 }
 0x266   : > { %v4713_v59 = vpop.f32.mrf.mxu1  ;;  %v4678_v48 = vpop.f32.mrf.mxu0 }
 0x267   : > { %v4714_v12 = vadd.f32 %v4713_v59, %v4712_v14 }
 0x268   : > { %v4715_v44 = vpop.f32.mrf.mxu1  ;;  %v4679_v9 = vpop.f32.mrf.mxu0 }
 0x269   : > { %v4680_v63 = vadd.f32 %v4679_v9, %v4678_v48  ;;  %v3591_v53 = vadd.f32 %v4714_v12, %v3526_v11 }
 0x26a   : > { %v4716_v17 = vpop.f32.mrf.mxu1  ;;  %v4681_v39 = vpop.f32.mrf.mxu0 }
 0x26b   : > { %v4717_v18 = vadd.f32 %v4716_v17, %v4715_v44  ;;  %v3534_v41 = vadd.f32 %v4680_v63, %v4209_v49 }
 0x26c   : > { %v4718_v37 = vpop.f32.mrf.mxu1  ;;  %v4682_v25 = vpop.f32.mrf.mxu0 }
 0x26d   : > { %v4683_v33 = vadd.f32 %v4682_v25, %v4681_v39 }
 0x26e   : > { %v4719_v27 = vpop.f32.mrf.mxu1  ;;  %v4684_v24 = vpop.f32.mrf.mxu0 }
 0x26f   : > { %v4720_v55 = vadd.f32 %v4719_v27, %v4718_v37  ;;  %v3539_v48 = vadd.f32 %v4683_v33, %v4209_v49 }
 0x270   : > { %v4721_v15 = vpop.f32.mrf.mxu1  ;;  %v4685_v23 = vpop.f32.mrf.mxu0 }
 0x271   : > { %v3599_v39 = vadd.f32 %v4720_v55, %v3534_v41 }
 0x272   : > { %v4722_v7 = vpop.f32.mrf.mxu1  ;;  %v4687_v57 = vpop.f32.mrf.mxu0 }
 0x273   : > { %v4723_v42 = vadd.f32 %v4722_v7, %v4721_v15 }
 0x274   : > { %v4724_v51 = vpop.f32.mrf.mxu1  ;;  %v4688_v29 = vpop.f32.mrf.mxu0 }
 0x275   : > { %v4689_v3 = vadd.f32 %v4688_v29, %v4687_v57 }
 0x276   : > { %v4725_v19 = vpop.f32.mrf.mxu1  ;;  %v4690_v52 = vpop.f32.mrf.mxu0 }
 0x277   : > { %v4726_v14 = vadd.f32 %v4725_v19, %v4724_v51  ;;  %v3547_v12 = vadd.f32 %v4689_v3, %v4209_v49  ;;  %v5230_v3 = vld [vmem:[%s5525_s17] sm:$0xff] }
 0x278   : > { %v4727_v50 = vpop.f32.mrf.mxu1  ;;  %v4691_v34 = vpop.f32.mrf.mxu0 }
 0x279   : > { %v4692_v25 = vadd.f32 %v4691_v34, %v4690_v52 }
 0x27a   : > { %v4728_v47 = vpop.f32.mrf.mxu1  ;;  %v4749_v28 = vpop.f32.mrf.mxu0 }
 0x27b   : > { %v4729_v27 = vadd.f32 %v4728_v47, %v4727_v50  ;;  %v3550_v50 = vadd.f32 %v4692_v25, %v4209_v49 }
 0x27c   : > { %v5914_v5 = vpop.f32.mrf.mxu1  ;;  %v4750_v36 = vpop.f32.mrf.mxu0 }
 0x27d   : > { %v4751_v44 = vadd.f32 %v4750_v36, %v4749_v28  ;;  %v3612_v34 = vadd.f32 %v4729_v27, %v3547_v12  ;;  %v5231_v27 = vld [vmem:[%s5525_s17 + $0x18] sm:$0xff]  ;;  %v6075_v12 = vld [vmem:[#allocation18_spill] sm:$0xff] }
 0x27e   : > { %v4731_v0 = vpop.f32.mrf.mxu1  ;;  %v5916_v35 = vpop.f32.mrf.mxu0 }
 0x27f   : > { %6063 = vst [vmem:[#allocation23_spill] sm:$0xff] %v5916_v35  ;;  %v3531_v35 = vadd.f32 %v4677_v45, %v4209_v49  ;;  %v3604_v45 = vadd.f32 %v4723_v42, %v3539_v48  ;;  %v4732_v7 = vadd.f32 %v4731_v0, %v5914_v5 }
 0x280   : > { %v4789_v21 = vpop.f32.mrf.mxu1  ;;  %v5918_v38 = vpop.f32.mrf.mxu0 }
 0x281   : > { %6064 = vst [vmem:[#allocation24_spill] sm:$0xff] %v5918_v38  ;;  %v3588_v38 = vadd.f32 %v4711_v10, %v3523_v8  ;;  %v3596_v59 = vadd.f32 %v4717_v18, %v3531_v35 }
 0x282   : > { %v4790_v56 = vpop.f32.mrf.mxu1  ;;  %v4755_v40 = vpop.f32.mrf.mxu0 }
 0x283   : > { %v4791_v10 = vadd.f32 %v4790_v56, %v4789_v21  ;;  %v3653_v33 = vadd.f32 %v4751_v44, %v3588_v38  ;;  %v3615_v38 = vadd.f32 %v4732_v7, %v3550_v50  ;;  %v6076_v7 = vld [vmem:[#allocation15_spill] sm:$0xff] }
 0x284   : > { %v5920_v43 = vpop.f32.mrf.mxu1  ;;  %v4756_v1 = vpop.f32.mrf.mxu0 }
 0x285   : > { %6065 = vst [vmem:[#allocation25_spill] sm:$0xff] %v5920_v43  ;;  %v4757_v62 = vadd.f32 %v4756_v1, %v4755_v40 }
 0x286   : > { %v5922_v58 = vpop.f32.mrf.mxu1  ;;  %v4758_v26 = vpop.f32.mrf.mxu0  ;;  %v6068_v51 = vld [vmem:[#allocation23_spill] sm:$0xff] }
 0x287   : > { %6066 = vst [vmem:[#allocation26_spill] sm:$0xff] %v5922_v58  ;;  %v4686_v58 = vadd.f32 %v4685_v23, %v4684_v24  ;;  %v3661_v24 = vadd.f32 %v4757_v62, %v3596_v59 }
 0x288   : > { %v4795_v2 = vpop.f32.mrf.mxu1  ;;  %v4759_v54 = vpop.f32.mrf.mxu0  ;;  %v6069_v29 = vld [vmem:[#allocation24_spill] sm:$0xff] }
 0x289   : > { %v3542_v37 = vadd.f32 %v4686_v58, %v4209_v49  ;;  %v4760_v15 = vadd.f32 %v4759_v54, %v4758_v26  ;;  %v4754_v19 = vadd.f32 %v6069_v29, %v6068_v51  ;;  %v6078_v29 = vld [vmem:[#allocation14_spill] sm:$0xff] }
 0x28a   : > { %v4796_v60 = vpop.f32.mrf.mxu1  ;;  %v4761_v30 = vpop.f32.mrf.mxu0 }
 0x28b   : > { %v4797_v9 = vadd.f32 %v4796_v60, %v4795_v2  ;;  %v3607_v63 = vadd.f32 %v4726_v14, %v3542_v37  ;;  %v3664_v58 = vadd.f32 %v4760_v15, %v3599_v39 }
 0x28c   : > { %v4798_v6 = vpop.f32.mrf.mxu1  ;;  %v4762_v46 = vpop.f32.mrf.mxu0  ;;  %v6070_v56 = vld [vmem:[#allocation25_spill] sm:$0xff] }
 0x28d   : > { %v3726_v52 = vadd.f32 %v4797_v9, %v3661_v24  ;;  %v4763_v47 = vadd.f32 %v4762_v46, %v4761_v30 }
 0x28e   : > { %v4799_v13 = vpop.f32.mrf.mxu1  ;;  %v5927_v22 = vpop.f32.mrf.mxu0  ;;  %v6071_v40 = vld [vmem:[#allocation26_spill] sm:$0xff] }
 0x28f   : > { %6067 = vst [vmem:[#allocation27_spill] sm:$0xff] %v5927_v22  ;;  %v4800_v28 = vadd.f32 %v4799_v13, %v4798_v6  ;;  %v4794_v1 = vadd.f32 %v6071_v40, %v6070_v56  ;;  %v3656_v6 = vadd.f32 %v4754_v19, %v3591_v53  ;;  %v3669_v32 = vadd.f32 %v4763_v47, %v3604_v45  ;;  %v6080_v56 = vld [vmem:[#allocation16_spill] sm:$0xff] }
 0x290   : > { %v4801_v4 = vpop.f32.mrf.mxu1  ;;  %v5929_v20 = vpop.f32.mrf.mxu0 }
 0x291   : > { %v3729_v46 = vadd.f32 %v4800_v28, %v3664_v58  ;;  %v3721_v59 = vadd.f32 %v4794_v1, %v3656_v6  ;;  %v6081_v58 = vld [vmem:[#allocation19_spill] sm:$0xff] }
 0x292   : > { %v4802_v31 = vpop.f32.mrf.mxu1  ;;  %v4767_v43 = vpop.f32.mrf.mxu0 }
 0x293   : > { %v4803_v26 = vadd.f32 %v4802_v31, %v4801_v4  ;;  %v6073_v4 = vld [vmem:[#allocation17_spill] sm:$0xff] }
 0x294   : > { %v5931_v22 = vpop.f32.mrf.mxu1  ;;  %v4768_v16 = vpop.f32.mrf.mxu0 }
 0x295   : > { %v4769_v57 = vadd.f32 %v4768_v16, %v4767_v43  ;;  %v3718_v43 = vadd.f32 %v4791_v10, %v3653_v33  ;;  %v3734_v37 = vadd.f32 %v4803_v26, %v3669_v32  ;;  %v6077_v33 = vld [vmem:[#allocation22_spill] sm:$0xff] }
 0x296   : > { %v4805_v17 = vpop.f32.mrf.mxu1  ;;  %v4770_v8 = vpop.f32.mrf.mxu0  ;;  %v6072_v11 = vld [vmem:[#allocation27_spill] sm:$0xff] }
 0x297   : > { %v3677_v2 = vadd.f32 %v4769_v57, %v3612_v34  ;;  %v4766_v55 = vadd.f32 %v5929_v20, %v6072_v11  ;;  %v4806_v48 = vadd.f32 %v4805_v17, %v5931_v22  ;;  %v6074_v20 = vld [vmem:[#allocation13_spill] sm:$0xff]  ;;  %v5232_v22 = vld [vmem:[%s5525_s17 + $0x30] sm:$0xff]  ;;  %v2220_v57 = vmul.f32 %v6076_v7, %v6075_v12 }
 0x298   : > { %v4807_v23 = vpop.f32.mrf.mxu1  ;;  %v4771_v18 = vpop.f32.mrf.mxu0  ;;  %v5235_v34 = vld [vmem:[%s5525_s17 + $0x20] sm:$0xff] }
 0x299   : > { %v4772_v54 = vadd.f32 %v4771_v18, %v4770_v8  ;;  %v3672_v24 = vadd.f32 %v4766_v55, %v3607_v63  ;;  %v5233_v18 = vld [vmem:[%s6028_s4 + $0x1] ss:$0 sm:$0xff]  ;;  %v5234_v63 = vld [vmem:[%s5525_s17 + $0x8] sm:$0xff] }
 0x29a   : > { %v4808_v36 = vpop.f32.mrf.mxu1  ;;  %v4891_v21 = vpop.f32.mrf.mxu0  ;;  %v2004_v51 = vadd.f32 %v5233_v18, %v6077_v33 }
 0x29b   : > { %v4809_v35 = vadd.f32 %v4808_v36, %v4807_v23  ;;  %v3791_v0 = vadd.f32 %v4891_v21, %v3726_v52  ;;  %v3680_v44 = vadd.f32 %v4772_v54, %v3615_v38  ;;  %v6079_v52 = vld [vmem:[#allocation21_spill] sm:$0xff]  ;;  %v3737_v21 = vadd.f32 %v4806_v48, %v3672_v24 }
 0x29c   : > { %v4810_v5 = vpop.f32.mrf.mxu1  ;;  %v3782_v60 = vpop.f32.mrf.mxu0  ;;  %v2228_v26 = vadd.f32 %v2220_v57, %v2004_v51 }
 0x29d   : > { %v3815_v13 = vadd.f32 %v5229_v61, %v3791_v0  ;;  %v3783_v30 = vadd.f32 %v3782_v60, %v3718_v43  ;;  %v3742_v41 = vadd.f32 %v4809_v35, %v3677_v2  ;;  %v5236_v0 = vld [vmem:[%s5525_s17 + $0x38] sm:$0xff]  ;;  %v5237_v60 = vld [vmem:[%s5525_s17 + $0x28] sm:$0xff]  ;;  %s5370_s17 = smov [#allocation9]  }
 0x29e   : > { %v4811_v49 = vpop.f32.mrf.mxu1  ;;  %v4892_v62 = vpop.f32.mrf.mxu0  ;;  %v6082_v2 = vld [vmem:[#allocation20_spill] sm:$0xff]  ;;  %s5296_s23 = sshll.u32 %s5370_s17, 4  ;;  %s5297_s23 = int_to_ptr.vmem [resolvable:$false] %s5296_s23 }
 0x29f   : > { %v4812_v42 = vadd.f32 %v4811_v49, %v4810_v5  ;;  %v3823_v31 = vadd.f32 %v3815_v13, %v6073_v4  ;;  %v3813_v14 = vadd.f32 %v5230_v3, %v3783_v30  ;;  %v3794_v16 = vadd.f32 %v4892_v62, %v3729_v46  ;;  %s5298_s27 = scalar_lea.vmem %s5297_s23, 2048  ;;  %p5299_p10 = scmp.lt.s32.totalorder %s5979_s29, %s5297_s23 }
 0x2a0   : > { %v4895_v53 = vpop.f32.mrf.mxu1  ;;  %v3785_v39 = vpop.f32.mrf.mxu0  ;;  %p5300_p2 = scmp.lt.s32.totalorder %s5298_s27, %s5292_s15 }
 0x2a1   : > { %v3807_v9 = vadd.f32 %v4895_v53, %v3742_v41  ;;  %3831 = vst [vmem:[%s5946_s16 + $0x10] sm:$0xff] %v3823_v31  ;;  %v3821_v25 = vadd.f32 %v3813_v14, %v6074_v20  ;;  %v3816_v8 = vadd.f32 %v5231_v27, %v3794_v16  ;;  %v3786_v45 = vadd.f32 %v3785_v39, %v3721_v59 }
 0x2a2   : > { %v3798_v10 = vpop.f32.mrf.mxu1  ;;  %v3745_v23 = vadd.f32 %v4812_v42, %v3680_v44  ;;  %p5301_p13 = por %p5300_p2, %p5299_p10 }
 0x2a3   : > { %v3819_v17 = vadd.f32 %v5232_v22, %v3807_v9  ;;  %v3799_v15 = vadd.f32 %v3798_v10, %v3734_v37  ;;  %3829 = vst [vmem:[%s5946_s16] sm:$0xff] %v3821_v25  ;;  %v3824_v19 = vadd.f32 %v3816_v8, %v6078_v29  ;;  %v3814_v28 = vadd.f32 %v5234_v63, %v3786_v45 }
 0x2a4   : > { %v4896_v36 = vpop.f32.mrf.mxu1  ;;  %p5302_p0 = pnand %p5301_p13, %p5295_p12 }
 0x2a5   : > { %v3827_v50 = vadd.f32 %v3819_v17, %v6079_v52  ;;  %v3817_v47 = vadd.f32 %v5235_v34, %v3799_v15  ;;  %v3810_v35 = vadd.f32 %v4896_v36, %v3745_v23  ;;  %3832 = vst [vmem:[%s5946_s16 + $0x18] sm:$0xff] %v3824_v19  ;;  %v3822_v40 = vadd.f32 %v3814_v28, %v6080_v56 }
 0x2a6   : > { %v3801_v1 = vpop.f32.mrf.mxu1 }
 0x2a7   : > { %3835 = vst [vmem:[%s5946_s16 + $0x30] sm:$0xff] %v3827_v50  ;;  %v3825_v5 = vadd.f32 %v3817_v47, %v6081_v58  ;;  %v3820_v43 = vadd.f32 %v5236_v0, %v3810_v35  ;;  %v3802_v38 = vadd.f32 %v3801_v1, %v3737_v21  ;;  %3830 = vst [vmem:[%s5946_s16 + $0x8] sm:$0xff] %v3822_v40 }
 0x2a9   : > { %3833 = vst [vmem:[%s5946_s16 + $0x20] sm:$0xff] %v3825_v5  ;;  %v3828_v54 = vadd.f32 %v3820_v43, %v6082_v2  ;;  %v3818_v6 = vadd.f32 %v5237_v60, %v3802_v38 }
 0x2ab   : > { %3836 = vst [vmem:[%s5946_s16 + $0x38] sm:$0xff] %v3828_v54  ;;  %v3826_v61 = vadd.f32 %v3818_v6, %v2228_v26 }
 0x2ad   : > { %3834 = vst [vmem:[%s5946_s16 + $0x28] sm:$0xff] %v3826_v61 }
 0x2ae   : > { %5305 = shalt.err (!%p5302_p0)
}
 0x2af   : > { %s5306_s28 = scalar_lea.hbm %s5977_s8, 1024  ;;  %s5310_s16 = scalar_lea.hbm %s6029_s5, 2048 }
 0x2b0   : > { %p5307_p5 = scmp.ne.s32.totalorder %s5977_s8, %s5306_s28  ;;  %p5311_p4 = scmp.lt.s32.totalorder %s5977_s8, %s6029_s5 }
 0x2b1   : > { %p5312_p6 = scmp.lt.s32.totalorder %s5310_s16, %s5306_s28 }
 0x2b2   : > { %p5308_p9 = pnand %p5307_p5, %p6083_p11 }
 0x2b3   : > { %p5313_p8 = por %p5312_p6, %p5311_p4 }
 0x2b4   : > { %p5309_p1 = pneg %p5308_p9 }
 0x2b6   : > { %p5314_p3 = pnand %p5313_p8, %p5309_p1 }
 0x2b8   : > { %5317 = shalt.err (!%p5314_p3)
}
 0x2b9   : > { %s5371_s26 = smov 128   ;;  %s5372_s6 = smov 8  }
 0x2ba   : > { %4919 = dma.vmem_to_hbm [thread:$0]  (%p6083_p11), %s5979_s29, 1024, %s5977_s8, %s3838_s22, %s5371_s26, %s5371_s26, %s5372_s6  }
 0x2bb PF: > { %s3866_s7 = sand.u32 1, %s5348_s18   ;;  %p6084_p7 = scmp.ne.s32.totalorder %s6035_s25, 0 }
 0x2bc   : > { %p6085_p12 = scmp.ge.s32.totalorder %s5360_s21, 2  ;;  %s3867_s15 = scalar_lea.sflag [#allocation6], %s3866_s7 }
 0x2be   : > { %p4930_p10 = pnand %p6085_p12, %p6084_p7 }
 0x2c0   : > { %p4931_p2 = pneg %p4930_p10 }
 0x2c2   : > { %5343 = dma.done.wait (%p4931_p2), %s3867_s15, 1024  }
 0x2c3   : > { %5345 = vsyncadd (%p4931_p2), %s3867_s15, 4294966272  ;;  %p19_p13 = scmp.ge.s32.totalorder %s5457_s30, 4   ;;  %s6086_s18 = smov %s5352_s19 }
 0x2c4   : > { %s6087_s19 = smov %s5356_s20  ;;  %s6088_s20 = smov %s5474_s13 }
 0x2c5   : > { %s6089_s21 = smov %s5457_s30  ;;  %21 = sbr.rel (!%p19_p13) target bundleno = 6 (0x6), region = 95 }
 0x2ca   :  { %3872 = vsyncpa [#allocation5], 1 }
 0x2cb   :  { %3874 = vsyncpa [#allocation5 + $0x1], 1 }
 0x2cc   :  { %3875 = vsyncpa [#allocation8], 1 }
 0x2cd   :  { %3876 = vsyncpa [#allocation6], 1 }
 0x2ce   :  { %3878 = vsyncpa [#allocation6 + $0x1], 1 }

</bundles_post_ra>
